<compile_context>
chip_gen: v7x
topology: tpu7x:2x2x1
jax: 0.10.0
libtpu: 0.0.40
codegen_flags: <defaults>
</compile_context>

<pallas_src>
import functools

import jax
import jax.numpy as jnp
from jax.experimental import pallas as pl
from jax.experimental.pallas import tpu as pltpu


# Explicit scoped-VMEM budget (actual per-step residency here is << 1 MiB;
# 32 MiB leaves headroom and is safe on v5e/v6e/v7x).
_VMEM_LIMIT = 32 * 1024 * 1024


# -----------------------------------------------------------------------------
# Block-banded weights: fold the kw taps and the W output positions into the
# MXU contraction / output dims.  For each (kd, kh) one matmul
#   (H, (W+2)*Cin) @ ((W+2)*Cin, W*Cout)
# produces a whole lane-dense output row block.
# NOTE: this matrix is O(9 * W^2 * Cin * Cout) -- ideal for small/medium W and
# small channel counts (the regime of this block); for large W switch to the
# (H*W, 9*Cin) im2col-concat formulation instead.
# -----------------------------------------------------------------------------
def _band_weights(w, W):
    """w: (3, 3, 3, Cin, Cout) -> (9, (W+2)*Cin, W*Cout), kd-major / kh-minor."""
    _, _, _, Cin, Cout = w.shape
    wb = jnp.zeros((3, 3, (W + 2) * Cin, W * Cout), w.dtype)
    for wpos in range(W):
        for kw in range(3):
            wb = wb.at[:, :,
                       (wpos + kw) * Cin:(wpos + kw + 1) * Cin,
                       wpos * Cout:(wpos + 1) * Cout].set(w[:, :, kw])
    return wb.reshape(9, (W + 2) * Cin, W * Cout)


# -----------------------------------------------------------------------------
# Kernel 1: 3x3x3 conv (padding=1) + bias, with an optional fused input
# epilogue (previous stage's BN affine + ReLU + residual add), plus per-(n, d)
# column sums / sums-of-squares for the *next* BatchNorm's batch statistics.
#
# grid = (N, D, 3):  n, output depth d (both "parallel"), kd ("arbitrary",
# accumulated into a VMEM scratch; init at kd==0, finalize at kd==2).
# The input BlockSpec streams one (H, W*Cin) depth slab per step (clamped
# depth index; out-of-range taps are skipped with pl.when), so VMEM stays
# O(H*W*C) regardless of D  (v7x 64 MiB friendly).
# -----------------------------------------------------------------------------
def _make_conv_kernel(D, H, Cin, fused, with_res):
    def kernel(*refs):
        i = 0
        x_ref = refs[i]; i += 1
        if with_res:
            r_ref = refs[i]; i += 1
        if fused:
            sc_ref = refs[i]; sh_ref = refs[i + 1]; i += 2
        wb_ref, b_ref, y_ref, s_ref, ss_ref, acc_ref = refs[i:]

        d = pl.program_id(1)
        kd = pl.program_id(2)

        @pl.when(kd == 0)
        def _init():
            acc_ref[...] = jnp.zeros_like(acc_ref)

        sd = d + kd - 1  # source depth of this tap (padding=1)

        @pl.when(jnp.logical_and(sd >= 0, sd <= D - 1))
        def _accumulate():
            slab = x_ref[0, 0]                                   # (H, W*Cin) f32
            if fused:
                # fused epilogue of the previous stage (BN affine + ReLU [+res]),
                # kept in f32 on the lane-dense layout.
                slab = jnp.maximum(slab * sc_ref[...] + sh_ref[...], 0.0)
                if with_res:
                    slab = slab + r_ref[0, 0]
            # zero halo: one row top/bottom (H) and one pixel (= Cin lanes)
            # left/right (W) -- built in VMEM, no HBM-side jnp.pad.
            zrow = jnp.zeros((1, slab.shape[1]), jnp.float32)
            slab = jnp.concatenate([zrow, slab, zrow], axis=0)   # (H+2, W*Cin)
            zcol = jnp.zeros((H + 2, Cin), jnp.float32)
            slab = jnp.concatenate([zcol, slab, zcol], axis=1)   # (H+2, (W+2)*Cin)

            contrib = None
            for kh in range(3):
                rows = slab[kh:kh + H, :].astype(jnp.bfloat16)   # bf16 MXU operand
                t = jnp.dot(rows, wb_ref[kd * 3 + kh],
                            preferred_element_type=jnp.float32)  # (H, W*Cout) f32
                contrib = t if contrib is None else contrib + t
            acc_ref[...] += contrib

        @pl.when(kd == 2)
        def _finalize():
            out = acc_ref[...] + b_ref[...]                      # (H, W*Cout) f32
            y_ref[0, 0] = out                                    # lane-dense store
            s_ref[0, 0] = jnp.sum(out, axis=0, keepdims=True)    # (1, W*Cout)
            ss_ref[0, 0] = jnp.sum(out * out, axis=0, keepdims=True)

    return kernel


def conv3d_bn_fused_pallas(x_flat, wb, bias_t, *, D, H, W, Cin, Cout,
                           scale_t=None, shift_t=None, residual_flat=None):
    """x_flat: (N, D, H, W*Cin) f32 (channels-last, W flattened onto lanes).
    wb: (9, (W+2)*Cin, W*Cout) bf16 banded weights.  bias_t: (1, W*Cout) f32.
    If scale_t/shift_t are given, relu(x*scale + shift) [+ residual] is applied
    to the input on the fly (fused previous-stage BN+ReLU(+residual)).
    Returns y (N, D, H, W*Cout) plus per-(n, d) column sums / sumsq."""
    N = x_flat.shape[0]
    WCi, WCo = W * Cin, W * Cout
    fused = scale_t is not None
    with_res = residual_flat is not None

    def slab_map(n, d, kd):
        return (n, jnp.maximum(jnp.minimum(d + kd - 1, D - 1), 0), 0, 0)

    slab_spec = pl.BlockSpec((1, 1, H, WCi), slab_map)
    vec_ci_spec = pl.BlockSpec((1, WCi), lambda n, d, kd: (0, 0))
    vec_co_spec = pl.BlockSpec((1, WCo), lambda n, d, kd: (0, 0))
    wb_spec = pl.BlockSpec(wb.shape, lambda n, d, kd: (0, 0, 0))

    args, in_specs = [x_flat], [slab_spec]
    if with_res:
        args.append(residual_flat)
        in_specs.append(slab_spec)
    if fused:
        args += [scale_t, shift_t]
        in_specs += [vec_ci_spec, vec_ci_spec]
    args += [wb, bias_t]
    in_specs += [wb_spec, vec_co_spec]

    kernel = _make_conv_kernel(D, H, Cin, fused, with_res)
    return pl.pallas_call(
        kernel,
        out_shape=(jax.ShapeDtypeStruct((N, D, H, WCo), jnp.float32),
                   jax.ShapeDtypeStruct((N, D, 1, WCo), jnp.float32),
                   jax.ShapeDtypeStruct((N, D, 1, WCo), jnp.float32)),
        grid=(N, D, 3),
        in_specs=in_specs,
        out_specs=(pl.BlockSpec((1, 1, H, WCo), lambda n, d, kd: (n, d, 0, 0)),
                   pl.BlockSpec((1, 1, 1, WCo), lambda n, d, kd: (n, d, 0, 0)),
                   pl.BlockSpec((1, 1, 1, WCo), lambda n, d, kd: (n, d, 0, 0))),
        scratch_shapes=[pltpu.VMEM((H, WCo), jnp.float32)],
        compiler_params=pltpu.CompilerParams(
            dimension_semantics=("parallel", "parallel", "arbitrary"),
            vmem_limit_bytes=_VMEM_LIMIT),
    )(*args)


# -----------------------------------------------------------------------------
# Kernel 2: BN affine + ReLU + 2x2x2 max-pool (stride 2) in a single pass.
# Input is lane-dense (N, D, H, W*C); each grid step consumes one depth pair
# and writes one pooled depth slice (N, D/2, H/2, (W/2)*C), lane-dense.
# All math in f32 (v5e has no bf16 VPU).
# -----------------------------------------------------------------------------
def _bn_relu_pool_kernel(y_ref, sc_ref, sh_ref, o_ref, *, H, W, C):
    H2, W2 = H // 2, W // 2
    z = jnp.maximum(y_ref[0] * sc_ref[...] + sh_ref[...], 0.0)   # (2, H, W*C)
    m = jnp.maximum(z[0], z[1])                                  # depth pair
    m = m.reshape(H2, 2, W * C)
    m = jnp.maximum(m[:, 0, :], m[:, 1, :])                      # H pair  (H2, W*C)
    m = m.reshape(H2, W2, 2 * C)
    m = jnp.maximum(m[:, :, :C], m[:, :, C:])                    # W pair  (H2, W2, C)
    o_ref[0, 0] = m.reshape(H2, W2 * C)                          # lane-dense store


def bn_relu_maxpool_pallas(y_flat, scale_t, shift_t, *, H, W, C):
    N, D = y_flat.shape[0], y_flat.shape[1]
    D2, H2, W2 = D // 2, H // 2, W // 2
    WC = W * C
    kernel = functools.partial(_bn_relu_pool_kernel, H=H, W=W, C=C)
    return pl.pallas_call(
        kernel,
        out_shape=jax.ShapeDtypeStruct((N, D2, H2, W2 * C), jnp.float32),
        grid=(N, D2),
        in_specs=[pl.BlockSpec((1, 2, H, WC), lambda n, p: (n, p, 0, 0)),
                  pl.BlockSpec((1, WC), lambda n, p: (0, 0)),
                  pl.BlockSpec((1, WC), lambda n, p: (0, 0))],
        out_specs=pl.BlockSpec((1, 1, H2, W2 * C), lambda n, p: (n, p, 0, 0)),
        compiler_params=pltpu.CompilerParams(
            dimension_semantics=("parallel", "parallel"),
            vmem_limit_bytes=_VMEM_LIMIT),
    )(y_flat, scale_t, shift_t)


# BN affine + ReLU only (bottleneck=True path, no pooling).
def _bn_relu_kernel(y_ref, sc_ref, sh_ref, o_ref):
    o_ref[...] = jnp.maximum(y_ref[...] * sc_ref[...] + sh_ref[...], 0.0)


def bn_relu_pallas(y_flat, scale_t, shift_t):
    N, D, H, WC = y_flat.shape
    return pl.pallas_call(
        _bn_relu_kernel,
        out_shape=jax.ShapeDtypeStruct((N, D, H, WC), jnp.float32),
        grid=(N, D),
        in_specs=[pl.BlockSpec((1, 1, H, WC), lambda n, d: (n, d, 0, 0)),
                  pl.BlockSpec((1, WC), lambda n, d: (0, 0)),
                  pl.BlockSpec((1, WC), lambda n, d: (0, 0))],
        out_specs=pl.BlockSpec((1, 1, H, WC), lambda n, d: (n, d, 0, 0)),
        compiler_params=pltpu.CompilerParams(
            dimension_semantics=("parallel", "parallel"),
            vmem_limit_bytes=_VMEM_LIMIT),
    )(y_flat, scale_t, shift_t)


# -----------------------------------------------------------------------------
# BatchNorm (training-mode batch statistics) finalize: tiny scalar math in JAX.
# Produces per-channel scale/shift, pre-tiled to the flattened W*C lane layout.
# -----------------------------------------------------------------------------
def _finalize_bn(s, ss, gamma, beta, count, W, C, eps=1e-5):
    tot = jnp.sum(s, axis=(0, 1, 2)).reshape(W, C).sum(axis=0)     # (C,)
    tot2 = jnp.sum(ss, axis=(0, 1, 2)).reshape(W, C).sum(axis=0)   # (C,)
    mean = tot / count
    # single-pass biased variance (as PyTorch BN uses for normalization);
    # clamped at 0 against f32 cancellation for large counts.
    var = jnp.maximum(tot2 / count - mean * mean, 0.0)
    scale = gamma / jnp.sqrt(var + eps)
    shift = beta - mean * scale
    scale_t = jnp.tile(scale, W).reshape(1, W * C).astype(jnp.float32)
    shift_t = jnp.tile(shift, W).reshape(1, W * C).astype(jnp.float32)
    return scale_t, shift_t
    # TODO(synk): BatchNorm running-mean/var (momentum) buffer updates are not
    # modeled; they do not affect the training-mode forward output.


# -----------------------------------------------------------------------------
# Full Conv3DBlock forward (PyTorch semantics; fresh module => BN in train mode).
# Accepts / returns NCDHW like the PyTorch module.
# -----------------------------------------------------------------------------
def conv3d_block_forward(x_ncdhw, params, *, bottleneck=False):
    w1, b1, g1, be1, w2, b2, g2, be2 = params
    N, Cin, D, H, W = x_ncdhw.shape
    Cmid, Cout = w1.shape[-1], w2.shape[-1]
    count = N * D * H * W

    # layout glue: NCDHW -> NDHWC -> (N, D, H, W*C)  (channels on the lane dim)
    x_flat = jnp.transpose(x_ncdhw, (0, 2, 3, 4, 1)).astype(jnp.float32)
    x_flat = x_flat.reshape(N, D, H, W * Cin)

    wb1 = _band_weights(w1.astype(jnp.float32), W).astype(jnp.bfloat16)
    wb2 = _band_weights(w2.astype(jnp.float32), W).astype(jnp.bfloat16)
    b1_t = jnp.tile(b1, W).reshape(1, W * Cmid).astype(jnp.float32)
    b2_t = jnp.tile(b2, W).reshape(1, W * Cout).astype(jnp.float32)

    # conv1 (raw output y1 written once; BN1 batch stats from fused partial sums)
    y1, s1, ss1 = conv3d_bn_fused_pallas(
        x_flat, wb1, b1_t, D=D, H=H, W=W, Cin=Cin, Cout=Cmid)
    sc1, sh1 = _finalize_bn(s1, ss1, g1, be1, count, W, Cmid)

    # conv2 with BN1 + ReLU (+ residual, added after ReLU as in the PyTorch code)
    # fused into its input read -> the normalized activation never hits HBM.
    residual_flat = x_flat if Cin == Cmid else None
    y2, s2, ss2 = conv3d_bn_fused_pallas(
        y1, wb2, b2_t, D=D, H=H, W=W, Cin=Cmid, Cout=Cout,
        scale_t=sc1, shift_t=sh1, residual_flat=residual_flat)
    sc2, sh2 = _finalize_bn(s2, ss2, g2, be2, count, W, Cout)

    if bottleneck:
        out = bn_relu_pallas(y2, sc2, sh2)
        out = out.reshape(N, D, H, W, Cout)
    else:
        # TODO(synk): PyTorch MaxPool3d floors odd spatial sizes; only even
        # D/H/W are supported here (matches the U-Net use of this block).
        assert D % 2 == 0 and H % 2 == 0 and W % 2 == 0
        out = bn_relu_maxpool_pallas(y2, sc2, sh2, H=H, W=W, C=Cout)
        out = out.reshape(N, D // 2, H // 2, W // 2, Cout)
    return jnp.transpose(out, (0, 4, 1, 2, 3))  # back to NCDHW


def init_params(key, in_channels, out_channels):
    c_mid = out_channels // 2
    k = jax.random.split(key, 4)

    def conv_init(kk, cin, cout):
        fan_in = cin * 27
        return (jax.random.normal(kk, (3, 3, 3, cin, cout), jnp.float32)
                / jnp.sqrt(jnp.float32(fan_in)))

    w1 = conv_init(k[0], in_channels, c_mid)
    b1 = 0.1 * jax.random.normal(k[1], (c_mid,), jnp.float32)
    g1 = jnp.ones((c_mid,), jnp.float32)      # PyTorch BN default weight
    be1 = jnp.zeros((c_mid,), jnp.float32)    # PyTorch BN default bias
    w2 = conv_init(k[2], c_mid, out_channels)
    b2 = 0.1 * jax.random.normal(k[3], (out_channels,), jnp.float32)
    g2 = jnp.ones((out_channels,), jnp.float32)
    be2 = jnp.zeros((out_channels,), jnp.float32)
    return (w1, b1, g1, be1, w2, b2, g2, be2)


if __name__ == "__main__":
    key = jax.random.PRNGKey(0)
    kx, kp = jax.random.split(key)

    N, C_in, C_out, D, H, W = 2, 4, 8, 16, 16, 16
    x = jax.random.normal(kx, (N, C_in, D, H, W), jnp.float32)  # NCDHW like PyTorch
    params = init_params(kp, C_in, C_out)

    fwd = jax.jit(functools.partial(conv3d_block_forward, bottleneck=False))
    out = fwd(x, params)
    jax.block_until_ready(out)

    assert out.shape == (N, C_out, D // 2, H // 2, W // 2), out.shape
    assert out.dtype == jnp.float32
    print("KERNEL_OK")
</pallas_src>

<mosaic_0001>
module attributes {stable_mosaic.version = 11 : i64} {
  func.func @kernel(%arg0: i32, %arg1: i32, %arg2: i32, %arg3: memref<1x1x16x64xf32, #tpu.memory_space<vmem>>, %arg4: memref<9x72x64xbf16, #tpu.memory_space<vmem>>, %arg5: memref<1x64xf32, #tpu.memory_space<vmem>>, %arg6: memref<1x1x16x64xf32, #tpu.memory_space<vmem>>, %arg7: memref<1x1x1x64xf32, #tpu.memory_space<vmem>>, %arg8: memref<1x1x1x64xf32, #tpu.memory_space<vmem>>, %arg9: memref<16x64xf32, #tpu.memory_space<vmem>>) attributes {dimension_semantics = [#tpu.dimension_semantics<parallel>, #tpu.dimension_semantics<parallel>, #tpu.dimension_semantics<arbitrary>], iteration_bounds = array<i64: 2, 16, 3>, scalar_prefetch = 0 : i64, scratch_operands = 1 : i64, tpu.core_type = #tpu.core_type<tc>, window_params = [{transform_indices = @transform_0, window_bounds = array<i64: 1, 1, 16, 64>}, {pipeline_mode = #tpu.pipeline_mode<synchronous>, transform_indices = @transform_1, window_bounds = array<i64: 9, 72, 64>}, {pipeline_mode = #tpu.pipeline_mode<synchronous>, transform_indices = @transform_2, window_bounds = array<i64: 1, 64>}, {transform_indices = @transform_3, window_bounds = array<i64: 1, 1, 16, 64>}, {transform_indices = @transform_4, window_bounds = array<i64: 1, 1, 1, 64>}, {transform_indices = @transform_5, window_bounds = array<i64: 1, 1, 1, 64>}]} {
    %c0_i32 = arith.constant 0 : i32
    %0 = arith.cmpi eq, %arg2, %c0_i32 : i32
    %1 = arith.extui %0 : i1 to i32
    %c0_i32_0 = arith.constant 0 : i32
    %2 = arith.cmpi ne, %1, %c0_i32_0 : i32
    scf.if %2 {
      %cst = arith.constant 0.000000e+00 : f32
      %13 = vector.broadcast %cst : f32 to vector<16x64xf32>
      %c0 = arith.constant 0 : index
      %c0_4 = arith.constant 0 : index
      %14 = vector.load %arg9[%c0, %c0_4] : memref<16x64xf32, #tpu.memory_space<vmem>>, vector<16x64xf32>
      tpu.vector_store %arg9[%c0, %c0_4], %13 {strides = array<i32>} : memref<16x64xf32, #tpu.memory_space<vmem>>, vector<16x64xf32>,
    } else {
    }
    %3 = arith.addi %arg1, %arg2 : i32
    %c1_i32 = arith.constant 1 : i32
    %4 = arith.subi %3, %c1_i32 : i32
    %c0_i32_1 = arith.constant 0 : i32
    %5 = arith.cmpi sge, %4, %c0_i32_1 : i32
    %c15_i32 = arith.constant 15 : i32
    %6 = arith.cmpi sle, %4, %c15_i32 : i32
    %7 = arith.andi %5, %6 : i1
    %8 = arith.extui %7 : i1 to i32
    %c0_i32_2 = arith.constant 0 : i32
    %9 = arith.cmpi ne, %8, %c0_i32_2 : i32
    scf.if %9 {
      %c0 = arith.constant 0 : index
      %c0_4 = arith.constant 0 : index
      %c0_5 = arith.constant 0 : index
      %c0_6 = arith.constant 0 : index
      %13 = vector.load %arg3[%c0, %c0_4, %c0_5, %c0_6] : memref<1x1x16x64xf32, #tpu.memory_space<vmem>>, vector<1x1x16x64xf32>
      %14 = vector.shape_cast %13 : vector<1x1x16x64xf32> to vector<16x64xf32>
      %cst = arith.constant 0.000000e+00 : f32
      %15 = vector.broadcast %cst : f32 to vector<1x64xf32>
      %16 = tpu.concatenate %15, %14, %15 in 0 : vector<1x64xf32>, vector<16x64xf32>, vector<1x64xf32> -> vector<18x64xf32>
      %cst_7 = arith.constant 0.000000e+00 : f32
      %17 = vector.broadcast %cst_7 : f32 to vector<18x4xf32>
      %18 = tpu.concatenate %17, %16, %17 in 1 : vector<18x4xf32>, vector<18x64xf32>, vector<18x4xf32> -> vector<18x72xf32>
      %19 = vector.extract_strided_slice %18 {offsets = [0, 0], sizes = [16, 72], strides = [1, 1]} : vector<18x72xf32> to vector<16x72xf32>
      %20 = arith.truncf %19 : vector<16x72xf32> to vector<16x72xbf16>
      %c3_i32 = arith.constant 3 : i32
      %21 = arith.muli %arg2, %c3_i32 : i32
      %c0_i32_8 = arith.constant 0 : i32
      %22 = arith.addi %21, %c0_i32_8 : i32
      %23 = arith.index_cast %22 : i32 to index
      %c0_9 = arith.constant 0 : index
      %c0_10 = arith.constant 0 : index
      %24 = vector.load %arg4[%23, %c0_9, %c0_10] : memref<9x72x64xbf16, #tpu.memory_space<vmem>>, vector<1x72x64xbf16>
      %25 = vector.shape_cast %24 : vector<1x72x64xbf16> to vector<72x64xbf16>
      %cst_11 = arith.constant dense<0.000000e+00> : vector<16x64xf32>
      %26 = tpu.matmul %20, %25, %cst_11 {dimension_numbers = #tpu.dot_dimension_numbers<[1], [0], [0], [1], [0, 0, 1, 1], [], []>} : vector<16x72xbf16>, vector<72x64xbf16>, vector<16x64xf32> -> vector<16x64xf32>
      %27 = vector.extract_strided_slice %18 {offsets = [1, 0], sizes = [16, 72], strides = [1, 1]} : vector<18x72xf32> to vector<16x72xf32>
      %28 = arith.truncf %27 : vector<16x72xf32> to vector<16x72xbf16>
      %c3_i32_12 = arith.constant 3 : i32
      %29 = arith.muli %arg2, %c3_i32_12 : i32
      %c1_i32_13 = arith.constant 1 : i32
      %30 = arith.addi %29, %c1_i32_13 : i32
      %31 = arith.index_cast %30 : i32 to index
      %c0_14 = arith.constant 0 : index
      %c0_15 = arith.constant 0 : index
      %32 = vector.load %arg4[%31, %c0_14, %c0_15] : memref<9x72x64xbf16, #tpu.memory_space<vmem>>, vector<1x72x64xbf16>
      %33 = vector.shape_cast %32 : vector<1x72x64xbf16> to vector<72x64xbf16>
      %cst_16 = arith.constant dense<0.000000e+00> : vector<16x64xf32>
      %34 = tpu.matmul %28, %33, %cst_16 {dimension_numbers = #tpu.dot_dimension_numbers<[1], [0], [0], [1], [0, 0, 1, 1], [], []>} : vector<16x72xbf16>, vector<72x64xbf16>, vector<16x64xf32> -> vector<16x64xf32>
      %35 = arith.addf %26, %34 : vector<16x64xf32>
      %36 = vector.extract_strided_slice %18 {offsets = [2, 0], sizes = [16, 72], strides = [1, 1]} : vector<18x72xf32> to vector<16x72xf32>
      %37 = arith.truncf %36 : vector<16x72xf32> to vector<16x72xbf16>
      %c3_i32_17 = arith.constant 3 : i32
      %38 = arith.muli %arg2, %c3_i32_17 : i32
      %c2_i32_18 = arith.constant 2 : i32
      %39 = arith.addi %38, %c2_i32_18 : i32
      %40 = arith.index_cast %39 : i32 to index
      %c0_19 = arith.constant 0 : index
      %c0_20 = arith.constant 0 : index
      %41 = vector.load %arg4[%40, %c0_19, %c0_20] : memref<9x72x64xbf16, #tpu.memory_space<vmem>>, vector<1x72x64xbf16>
      %42 = vector.shape_cast %41 : vector<1x72x64xbf16> to vector<72x64xbf16>
      %cst_21 = arith.constant dense<0.000000e+00> : vector<16x64xf32>
      %43 = tpu.matmul %37, %42, %cst_21 {dimension_numbers = #tpu.dot_dimension_numbers<[1], [0], [0], [1], [0, 0, 1, 1], [], []>} : vector<16x72xbf16>, vector<72x64xbf16>, vector<16x64xf32> -> vector<16x64xf32>
      %44 = arith.addf %35, %43 : vector<16x64xf32>
      %c0_22 = arith.constant 0 : index
      %c0_23 = arith.constant 0 : index
      %45 = vector.load %arg9[%c0_22, %c0_23] : memref<16x64xf32, #tpu.memory_space<vmem>>, vector<16x64xf32>
      %46 = arith.addf %45, %44 : vector<16x64xf32>
      %c0_24 = arith.constant 0 : index
      %c0_25 = arith.constant 0 : index
      %47 = vector.load %arg9[%c0_24, %c0_25] : memref<16x64xf32, #tpu.memory_space<vmem>>, vector<16x64xf32>
      tpu.vector_store %arg9[%c0_24, %c0_25], %46 {strides = array<i32>} : memref<16x64xf32, #tpu.memory_space<vmem>>, vector<16x64xf32>,
    } else {
    }
    %c2_i32 = arith.constant 2 : i32
    %10 = arith.cmpi eq, %arg2, %c2_i32 : i32
    %11 = arith.extui %10 : i1 to i32
    %c0_i32_3 = arith.constant 0 : i32
    %12 = arith.cmpi ne, %11, %c0_i32_3 : i32
    scf.if %12 {
      %c0 = arith.constant 0 : index
      %c0_4 = arith.constant 0 : index
      %13 = vector.load %arg9[%c0, %c0_4] : memref<16x64xf32, #tpu.memory_space<vmem>>, vector<16x64xf32>
      %c0_5 = arith.constant 0 : index
      %c0_6 = arith.constant 0 : index
      %14 = vector.load %arg5[%c0_5, %c0_6] : memref<1x64xf32, #tpu.memory_space<vmem>>, vector<1x64xf32>
      %15 = vector.broadcast %14 : vector<1x64xf32> to vector<16x64xf32>
      %16 = arith.addf %13, %15 : vector<16x64xf32>
      %c0_7 = arith.constant 0 : index
      %c0_8 = arith.constant 0 : index
      %c0_9 = arith.constant 0 : index
      %c0_10 = arith.constant 0 : index
      %17 = vector.load %arg6[%c0_7, %c0_8, %c0_9, %c0_10] : memref<1x1x16x64xf32, #tpu.memory_space<vmem>>, vector<1x1x16x64xf32>
      %18 = vector.shape_cast %17 : vector<1x1x16x64xf32> to vector<16x64xf32>
      %19 = vector.shape_cast %16 : vector<16x64xf32> to vector<1x1x16x64xf32>
      tpu.vector_store %arg6[%c0_7, %c0_8, %c0_9, %c0_10], %19 {strides = array<i32>} : memref<1x1x16x64xf32, #tpu.memory_space<vmem>>, vector<1x1x16x64xf32>,
      %cst = arith.constant dense<0.000000e+00> : vector<64xf32>
      %20 = vector.multi_reduction <add>, %16, %cst [0] : vector<16x64xf32> to vector<64xf32>
      %21 = vector.shape_cast %20 : vector<64xf32> to vector<1x64xf32>
      %c0_11 = arith.constant 0 : index
      %c0_12 = arith.constant 0 : index
      %c0_13 = arith.constant 0 : index
      %c0_14 = arith.constant 0 : index
      %22 = vector.load %arg7[%c0_11, %c0_12, %c0_13, %c0_14] : memref<1x1x1x64xf32, #tpu.memory_space<vmem>>, vector<1x1x1x64xf32>
      %23 = vector.shape_cast %22 : vector<1x1x1x64xf32> to vector<1x64xf32>
      %24 = vector.shape_cast %21 : vector<1x64xf32> to vector<1x1x1x64xf32>
      tpu.vector_store %arg7[%c0_11, %c0_12, %c0_13, %c0_14], %24 {strides = array<i32>} : memref<1x1x1x64xf32, #tpu.memory_space<vmem>>, vector<1x1x1x64xf32>,
      %25 = arith.mulf %16, %16 : vector<16x64xf32>
      %cst_15 = arith.constant dense<0.000000e+00> : vector<64xf32>
      %26 = vector.multi_reduction <add>, %25, %cst_15 [0] : vector<16x64xf32> to vector<64xf32>
      %27 = vector.shape_cast %26 : vector<64xf32> to vector<1x64xf32>
      %c0_16 = arith.constant 0 : index
      %c0_17 = arith.constant 0 : index
      %c0_18 = arith.constant 0 : index
      %c0_19 = arith.constant 0 : index
      %28 = vector.load %arg8[%c0_16, %c0_17, %c0_18, %c0_19] : memref<1x1x1x64xf32, #tpu.memory_space<vmem>>, vector<1x1x1x64xf32>
      %29 = vector.shape_cast %28 : vector<1x1x1x64xf32> to vector<1x64xf32>
      %30 = vector.shape_cast %27 : vector<1x64xf32> to vector<1x1x1x64xf32>
      tpu.vector_store %arg8[%c0_16, %c0_17, %c0_18, %c0_19], %30 {strides = array<i32>} : memref<1x1x1x64xf32, #tpu.memory_space<vmem>>, vector<1x1x1x64xf32>,
    } else {
    }
    return
  }
  func.func @transform_0(%arg0: i32, %arg1: i32, %arg2: i32) -> (i32, i32, i32, i32) {
    %0 = arith.addi %arg1, %arg2 : i32
    %c1_i32 = arith.constant 1 : i32
    %1 = arith.subi %0, %c1_i32 : i32
    %c15_i32 = arith.constant 15 : i32
    %2 = arith.minsi %1, %c15_i32 : i32
    %c0_i32 = arith.constant 0 : i32
    %3 = arith.maxsi %2, %c0_i32 : i32
    %c0_i32_0 = arith.constant 0 : i32
    %c0_i32_1 = arith.constant 0 : i32
    %c0_i32_2 = arith.constant 0 : i32
    return %arg0, %3, %c0_i32_0, %c0_i32_1 : i32, i32, i32, i32
  }
  func.func @transform_1(%arg0: i32, %arg1: i32, %arg2: i32) -> (i32, i32, i32) {
    %c0_i32 = arith.constant 0 : i32
    %c0_i32_0 = arith.constant 0 : i32
    %c0_i32_1 = arith.constant 0 : i32
    %c0_i32_2 = arith.constant 0 : i32
    return %c0_i32, %c0_i32_0, %c0_i32_1 : i32, i32, i32
  }
  func.func @transform_2(%arg0: i32, %arg1: i32, %arg2: i32) -> (i32, i32) {
    %c0_i32 = arith.constant 0 : i32
    %c0_i32_0 = arith.constant 0 : i32
    %c0_i32_1 = arith.constant 0 : i32
    return %c0_i32, %c0_i32_0 : i32, i32
  }
  func.func @transform_3(%arg0: i32, %arg1: i32, %arg2: i32) -> (i32, i32, i32, i32) {
    %c0_i32 = arith.constant 0 : i32
    %c0_i32_0 = arith.constant 0 : i32
    %c0_i32_1 = arith.constant 0 : i32
    return %arg0, %arg1, %c0_i32, %c0_i32_0 : i32, i32, i32, i32
  }
  func.func @transform_4(%arg0: i32, %arg1: i32, %arg2: i32) -> (i32, i32, i32, i32) {
    %c0_i32 = arith.constant 0 : i32
    %c0_i32_0 = arith.constant 0 : i32
    %c0_i32_1 = arith.constant 0 : i32
    return %arg0, %arg1, %c0_i32, %c0_i32_0 : i32, i32, i32, i32
  }
  func.func @transform_5(%arg0: i32, %arg1: i32, %arg2: i32) -> (i32, i32, i32, i32) {
    %c0_i32 = arith.constant 0 : i32
    %c0_i32_0 = arith.constant 0 : i32
    %c0_i32_1 = arith.constant 0 : i32
    return %arg0, %arg1, %c0_i32, %c0_i32_0 : i32, i32, i32, i32
  }
}

module attributes {stable_mosaic.version = 11 : i64} {
  func.func @kernel(%arg0: i32, %arg1: i32, %arg2: i32, %arg3: memref<1x1x16x64xf32, #tpu.memory_space<vmem>>, %arg4: memref<1x1x16x64xf32, #tpu.memory_space<vmem>>, %arg5: memref<1x64xf32, #tpu.memory_space<vmem>>, %arg6: memref<1x64xf32, #tpu.memory_space<vmem>>, %arg7: memref<9x72x128xbf16, #tpu.memory_space<vmem>>, %arg8: memref<1x128xf32, #tpu.memory_space<vmem>>, %arg9: memref<1x1x16x128xf32, #tpu.memory_space<vmem>>, %arg10: memref<1x1x1x128xf32, #tpu.memory_space<vmem>>, %arg11: memref<1x1x1x128xf32, #tpu.memory_space<vmem>>, %arg12: memref<16x128xf32, #tpu.memory_space<vmem>>) attributes {dimension_semantics = [#tpu.dimension_semantics<parallel>, #tpu.dimension_semantics<parallel>, #tpu.dimension_semantics<arbitrary>], iteration_bounds = array<i64: 2, 16, 3>, scalar_prefetch = 0 : i64, scratch_operands = 1 : i64, tpu.core_type = #tpu.core_type<tc>, window_params = [{transform_indices = @transform_0, window_bounds = array<i64: 1, 1, 16, 64>}, {transform_indices = @transform_1, window_bounds = array<i64: 1, 1, 16, 64>}, {pipeline_mode = #tpu.pipeline_mode<synchronous>, transform_indices = @transform_2, window_bounds = array<i64: 1, 64>}, {pipeline_mode = #tpu.pipeline_mode<synchronous>, transform_indices = @transform_3, window_bounds = array<i64: 1, 64>}, {pipeline_mode = #tpu.pipeline_mode<synchronous>, transform_indices = @transform_4, window_bounds = array<i64: 9, 72, 128>}, {pipeline_mode = #tpu.pipeline_mode<synchronous>, transform_indices = @transform_5, window_bounds = array<i64: 1, 128>}, {transform_indices = @transform_6, window_bounds = array<i64: 1, 1, 16, 128>}, {transform_indices = @transform_7, window_bounds = array<i64: 1, 1, 1, 128>}, {transform_indices = @transform_8, window_bounds = array<i64: 1, 1, 1, 128>}]} {
    %c0_i32 = arith.constant 0 : i32
    %0 = arith.cmpi eq, %arg2, %c0_i32 : i32
    %1 = arith.extui %0 : i1 to i32
    %c0_i32_0 = arith.constant 0 : i32
    %2 = arith.cmpi ne, %1, %c0_i32_0 : i32
    scf.if %2 {
      %cst = arith.constant 0.000000e+00 : f32
      %13 = vector.broadcast %cst : f32 to vector<16x128xf32>
      %c0 = arith.constant 0 : index
      %c0_4 = arith.constant 0 : index
      %14 = vector.load %arg12[%c0, %c0_4] : memref<16x128xf32, #tpu.memory_space<vmem>>, vector<16x128xf32>
      tpu.vector_store %arg12[%c0, %c0_4], %13 {strides = array<i32>} : memref<16x128xf32, #tpu.memory_space<vmem>>, vector<16x128xf32>,
    } else {
    }
    %3 = arith.addi %arg1, %arg2 : i32
    %c1_i32 = arith.constant 1 : i32
    %4 = arith.subi %3, %c1_i32 : i32
    %c0_i32_1 = arith.constant 0 : i32
    %5 = arith.cmpi sge, %4, %c0_i32_1 : i32
    %c15_i32 = arith.constant 15 : i32
    %6 = arith.cmpi sle, %4, %c15_i32 : i32
    %7 = arith.andi %5, %6 : i1
    %8 = arith.extui %7 : i1 to i32
    %c0_i32_2 = arith.constant 0 : i32
    %9 = arith.cmpi ne, %8, %c0_i32_2 : i32
    scf.if %9 {
      %c0 = arith.constant 0 : index
      %c0_4 = arith.constant 0 : index
      %c0_5 = arith.constant 0 : index
      %c0_6 = arith.constant 0 : index
      %13 = vector.load %arg3[%c0, %c0_4, %c0_5, %c0_6] : memref<1x1x16x64xf32, #tpu.memory_space<vmem>>, vector<1x1x16x64xf32>
      %14 = vector.shape_cast %13 : vector<1x1x16x64xf32> to vector<16x64xf32>
      %c0_7 = arith.constant 0 : index
      %c0_8 = arith.constant 0 : index
      %15 = vector.load %arg5[%c0_7, %c0_8] : memref<1x64xf32, #tpu.memory_space<vmem>>, vector<1x64xf32>
      %16 = vector.broadcast %15 : vector<1x64xf32> to vector<16x64xf32>
      %17 = arith.mulf %14, %16 : vector<16x64xf32>
      %c0_9 = arith.constant 0 : index
      %c0_10 = arith.constant 0 : index
      %18 = vector.load %arg6[%c0_9, %c0_10] : memref<1x64xf32, #tpu.memory_space<vmem>>, vector<1x64xf32>
      %19 = vector.broadcast %18 : vector<1x64xf32> to vector<16x64xf32>
      %20 = arith.addf %17, %19 : vector<16x64xf32>
      %cst = arith.constant 0.000000e+00 : f32
      %21 = vector.broadcast %cst : f32 to vector<16x64xf32>
      %22 = arith.maximumf %20, %21 : vector<16x64xf32>
      %c0_11 = arith.constant 0 : index
      %c0_12 = arith.constant 0 : index
      %c0_13 = arith.constant 0 : index
      %c0_14 = arith.constant 0 : index
      %23 = vector.load %arg4[%c0_11, %c0_12, %c0_13, %c0_14] : memref<1x1x16x64xf32, #tpu.memory_space<vmem>>, vector<1x1x16x64xf32>
      %24 = vector.shape_cast %23 : vector<1x1x16x64xf32> to vector<16x64xf32>
      %25 = arith.addf %22, %24 : vector<16x64xf32>
      %cst_15 = arith.constant 0.000000e+00 : f32
      %26 = vector.broadcast %cst_15 : f32 to vector<1x64xf32>
      %27 = tpu.concatenate %26, %25, %26 in 0 : vector<1x64xf32>, vector<16x64xf32>, vector<1x64xf32> -> vector<18x64xf32>
      %cst_16 = arith.constant 0.000000e+00 : f32
      %28 = vector.broadcast %cst_16 : f32 to vector<18x4xf32>
      %29 = tpu.concatenate %28, %27, %28 in 1 : vector<18x4xf32>, vector<18x64xf32>, vector<18x4xf32> -> vector<18x72xf32>
      %30 = vector.extract_strided_slice %29 {offsets = [0, 0], sizes = [16, 72], strides = [1, 1]} : vector<18x72xf32> to vector<16x72xf32>
      %31 = arith.truncf %30 : vector<16x72xf32> to vector<16x72xbf16>
      %c3_i32 = arith.constant 3 : i32
      %32 = arith.muli %arg2, %c3_i32 : i32
      %c0_i32_17 = arith.constant 0 : i32
      %33 = arith.addi %32, %c0_i32_17 : i32
      %34 = arith.index_cast %33 : i32 to index
      %c0_18 = arith.constant 0 : index
      %c0_19 = arith.constant 0 : index
      %35 = vector.load %arg7[%34, %c0_18, %c0_19] : memref<9x72x128xbf16, #tpu.memory_space<vmem>>, vector<1x72x128xbf16>
      %36 = vector.shape_cast %35 : vector<1x72x128xbf16> to vector<72x128xbf16>
      %cst_20 = arith.constant dense<0.000000e+00> : vector<16x128xf32>
      %37 = tpu.matmul %31, %36, %cst_20 {dimension_numbers = #tpu.dot_dimension_numbers<[1], [0], [0], [1], [0, 0, 1, 1], [], []>} : vector<16x72xbf16>, vector<72x128xbf16>, vector<16x128xf32> -> vector<16x128xf32>
      %38 = vector.extract_strided_slice %29 {offsets = [1, 0], sizes = [16, 72], strides = [1, 1]} : vector<18x72xf32> to vector<16x72xf32>
      %39 = arith.truncf %38 : vector<16x72xf32> to vector<16x72xbf16>
      %c3_i32_21 = arith.constant 3 : i32
      %40 = arith.muli %arg2, %c3_i32_21 : i32
      %c1_i32_22 = arith.constant 1 : i32
      %41 = arith.addi %40, %c1_i32_22 : i32
      %42 = arith.index_cast %41 : i32 to index
      %c0_23 = arith.constant 0 : index
      %c0_24 = arith.constant 0 : index
      %43 = vector.load %arg7[%42, %c0_23, %c0_24] : memref<9x72x128xbf16, #tpu.memory_space<vmem>>, vector<1x72x128xbf16>
      %44 = vector.shape_cast %43 : vector<1x72x128xbf16> to vector<72x128xbf16>
      %cst_25 = arith.constant dense<0.000000e+00> : vector<16x128xf32>
      %45 = tpu.matmul %39, %44, %cst_25 {dimension_numbers = #tpu.dot_dimension_numbers<[1], [0], [0], [1], [0, 0, 1, 1], [], []>} : vector<16x72xbf16>, vector<72x128xbf16>, vector<16x128xf32> -> vector<16x128xf32>
      %46 = arith.addf %37, %45 : vector<16x128xf32>
      %47 = vector.extract_strided_slice %29 {offsets = [2, 0], sizes = [16, 72], strides = [1, 1]} : vector<18x72xf32> to vector<16x72xf32>
      %48 = arith.truncf %47 : vector<16x72xf32> to vector<16x72xbf16>
      %c3_i32_26 = arith.constant 3 : i32
      %49 = arith.muli %arg2, %c3_i32_26 : i32
      %c2_i32_27 = arith.constant 2 : i32
      %50 = arith.addi %49, %c2_i32_27 : i32
      %51 = arith.index_cast %50 : i32 to index
      %c0_28 = arith.constant 0 : index
      %c0_29 = arith.constant 0 : index
      %52 = vector.load %arg7[%51, %c0_28, %c0_29] : memref<9x72x128xbf16, #tpu.memory_space<vmem>>, vector<1x72x128xbf16>
      %53 = vector.shape_cast %52 : vector<1x72x128xbf16> to vector<72x128xbf16>
      %cst_30 = arith.constant dense<0.000000e+00> : vector<16x128xf32>
      %54 = tpu.matmul %48, %53, %cst_30 {dimension_numbers = #tpu.dot_dimension_numbers<[1], [0], [0], [1], [0, 0, 1, 1], [], []>} : vector<16x72xbf16>, vector<72x128xbf16>, vector<16x128xf32> -> vector<16x128xf32>
      %55 = arith.addf %46, %54 : vector<16x128xf32>
      %c0_31 = arith.constant 0 : index
      %c0_32 = arith.constant 0 : index
      %56 = vector.load %arg12[%c0_31, %c0_32] : memref<16x128xf32, #tpu.memory_space<vmem>>, vector<16x128xf32>
      %57 = arith.addf %56, %55 : vector<16x128xf32>
      %c0_33 = arith.constant 0 : index
      %c0_34 = arith.constant 0 : index
      %58 = vector.load %arg12[%c0_33, %c0_34] : memref<16x128xf32, #tpu.memory_space<vmem>>, vector<16x128xf32>
      tpu.vector_store %arg12[%c0_33, %c0_34], %57 {strides = array<i32>} : memref<16x128xf32, #tpu.memory_space<vmem>>, vector<16x128xf32>,
    } else {
    }
    %c2_i32 = arith.constant 2 : i32
    %10 = arith.cmpi eq, %arg2, %c2_i32 : i32
    %11 = arith.extui %10 : i1 to i32
    %c0_i32_3 = arith.constant 0 : i32
    %12 = arith.cmpi ne, %11, %c0_i32_3 : i32
    scf.if %12 {
      %c0 = arith.constant 0 : index
      %c0_4 = arith.constant 0 : index
      %13 = vector.load %arg12[%c0, %c0_4] : memref<16x128xf32, #tpu.memory_space<vmem>>, vector<16x128xf32>
      %c0_5 = arith.constant 0 : index
      %c0_6 = arith.constant 0 : index
      %14 = vector.load %arg8[%c0_5, %c0_6] : memref<1x128xf32, #tpu.memory_space<vmem>>, vector<1x128xf32>
      %15 = vector.broadcast %14 : vector<1x128xf32> to vector<16x128xf32>
      %16 = arith.addf %13, %15 : vector<16x128xf32>
      %c0_7 = arith.constant 0 : index
      %c0_8 = arith.constant 0 : index
      %c0_9 = arith.constant 0 : index
      %c0_10 = arith.constant 0 : index
      %17 = vector.load %arg9[%c0_7, %c0_8, %c0_9, %c0_10] : memref<1x1x16x128xf32, #tpu.memory_space<vmem>>, vector<1x1x16x128xf32>
      %18 = vector.shape_cast %17 : vector<1x1x16x128xf32> to vector<16x128xf32>
      %19 = vector.shape_cast %16 : vector<16x128xf32> to vector<1x1x16x128xf32>
      tpu.vector_store %arg9[%c0_7, %c0_8, %c0_9, %c0_10], %19 {strides = array<i32>} : memref<1x1x16x128xf32, #tpu.memory_space<vmem>>, vector<1x1x16x128xf32>,
      %cst = arith.constant dense<0.000000e+00> : vector<128xf32>
      %20 = vector.multi_reduction <add>, %16, %cst [0] : vector<16x128xf32> to vector<128xf32>
      %21 = vector.shape_cast %20 : vector<128xf32> to vector<1x128xf32>
      %c0_11 = arith.constant 0 : index
      %c0_12 = arith.constant 0 : index
      %c0_13 = arith.constant 0 : index
      %c0_14 = arith.constant 0 : index
      %22 = vector.load %arg10[%c0_11, %c0_12, %c0_13, %c0_14] : memref<1x1x1x128xf32, #tpu.memory_space<vmem>>, vector<1x1x1x128xf32>
      %23 = vector.shape_cast %22 : vector<1x1x1x128xf32> to vector<1x128xf32>
      %24 = vector.shape_cast %21 : vector<1x128xf32> to vector<1x1x1x128xf32>
      tpu.vector_store %arg10[%c0_11, %c0_12, %c0_13, %c0_14], %24 {strides = array<i32>} : memref<1x1x1x128xf32, #tpu.memory_space<vmem>>, vector<1x1x1x128xf32>,
      %25 = arith.mulf %16, %16 : vector<16x128xf32>
      %cst_15 = arith.constant dense<0.000000e+00> : vector<128xf32>
      %26 = vector.multi_reduction <add>, %25, %cst_15 [0] : vector<16x128xf32> to vector<128xf32>
      %27 = vector.shape_cast %26 : vector<128xf32> to vector<1x128xf32>
      %c0_16 = arith.constant 0 : index
      %c0_17 = arith.constant 0 : index
      %c0_18 = arith.constant 0 : index
      %c0_19 = arith.constant 0 : index
      %28 = vector.load %arg11[%c0_16, %c0_17, %c0_18, %c0_19] : memref<1x1x1x128xf32, #tpu.memory_space<vmem>>, vector<1x1x1x128xf32>
      %29 = vector.shape_cast %28 : vector<1x1x1x128xf32> to vector<1x128xf32>
      %30 = vector.shape_cast %27 : vector<1x128xf32> to vector<1x1x1x128xf32>
      tpu.vector_store %arg11[%c0_16, %c0_17, %c0_18, %c0_19], %30 {strides = array<i32>} : memref<1x1x1x128xf32, #tpu.memory_space<vmem>>, vector<1x1x1x128xf32>,
    } else {
    }
    return
  }
  func.func @transform_0(%arg0: i32, %arg1: i32, %arg2: i32) -> (i32, i32, i32, i32) {
    %0 = arith.addi %arg1, %arg2 : i32
    %c1_i32 = arith.constant 1 : i32
    %1 = arith.subi %0, %c1_i32 : i32
    %c15_i32 = arith.constant 15 : i32
    %2 = arith.minsi %1, %c15_i32 : i32
    %c0_i32 = arith.constant 0 : i32
    %3 = arith.maxsi %2, %c0_i32 : i32
    %c0_i32_0 = arith.constant 0 : i32
    %c0_i32_1 = arith.constant 0 : i32
    %c0_i32_2 = arith.constant 0 : i32
    return %arg0, %3, %c0_i32_0, %c0_i32_1 : i32, i32, i32, i32
  }
  func.func @transform_1(%arg0: i32, %arg1: i32, %arg2: i32) -> (i32, i32, i32, i32) {
    %0 = arith.addi %arg1, %arg2 : i32
    %c1_i32 = arith.constant 1 : i32
    %1 = arith.subi %0, %c1_i32 : i32
    %c15_i32 = arith.constant 15 : i32
    %2 = arith.minsi %1, %c15_i32 : i32
    %c0_i32 = arith.constant 0 : i32
    %3 = arith.maxsi %2, %c0_i32 : i32
    %c0_i32_0 = arith.constant 0 : i32
    %c0_i32_1 = arith.constant 0 : i32
    %c0_i32_2 = arith.constant 0 : i32
    return %arg0, %3, %c0_i32_0, %c0_i32_1 : i32, i32, i32, i32
  }
  func.func @transform_2(%arg0: i32, %arg1: i32, %arg2: i32) -> (i32, i32) {
    %c0_i32 = arith.constant 0 : i32
    %c0_i32_0 = arith.constant 0 : i32
    %c0_i32_1 = arith.constant 0 : i32
    return %c0_i32, %c0_i32_0 : i32, i32
  }
  func.func @transform_3(%arg0: i32, %arg1: i32, %arg2: i32) -> (i32, i32) {
    %c0_i32 = arith.constant 0 : i32
    %c0_i32_0 = arith.constant 0 : i32
    %c0_i32_1 = arith.constant 0 : i32
    return %c0_i32, %c0_i32_0 : i32, i32
  }
  func.func @transform_4(%arg0: i32, %arg1: i32, %arg2: i32) -> (i32, i32, i32) {
    %c0_i32 = arith.constant 0 : i32
    %c0_i32_0 = arith.constant 0 : i32
    %c0_i32_1 = arith.constant 0 : i32
    %c0_i32_2 = arith.constant 0 : i32
    return %c0_i32, %c0_i32_0, %c0_i32_1 : i32, i32, i32
  }
  func.func @transform_5(%arg0: i32, %arg1: i32, %arg2: i32) -> (i32, i32) {
    %c0_i32 = arith.constant 0 : i32
    %c0_i32_0 = arith.constant 0 : i32
    %c0_i32_1 = arith.constant 0 : i32
    return %c0_i32, %c0_i32_0 : i32, i32
  }
  func.func @transform_6(%arg0: i32, %arg1: i32, %arg2: i32) -> (i32, i32, i32, i32) {
    %c0_i32 = arith.constant 0 : i32
    %c0_i32_0 = arith.constant 0 : i32
    %c0_i32_1 = arith.constant 0 : i32
    return %arg0, %arg1, %c0_i32, %c0_i32_0 : i32, i32, i32, i32
  }
  func.func @transform_7(%arg0: i32, %arg1: i32, %arg2: i32) -> (i32, i32, i32, i32) {
    %c0_i32 = arith.constant 0 : i32
    %c0_i32_0 = arith.constant 0 : i32
    %c0_i32_1 = arith.constant 0 : i32
    return %arg0, %arg1, %c0_i32, %c0_i32_0 : i32, i32, i32, i32
  }
  func.func @transform_8(%arg0: i32, %arg1: i32, %arg2: i32) -> (i32, i32, i32, i32) {
    %c0_i32 = arith.constant 0 : i32
    %c0_i32_0 = arith.constant 0 : i32
    %c0_i32_1 = arith.constant 0 : i32
    return %arg0, %arg1, %c0_i32, %c0_i32_0 : i32, i32, i32, i32
  }
}

module attributes {stable_mosaic.version = 11 : i64} {
  func.func @_bn_relu_pool_kernel(%arg0: i32, %arg1: i32, %arg2: memref<1x2x16x128xf32, #tpu.memory_space<vmem>>, %arg3: memref<1x128xf32, #tpu.memory_space<vmem>>, %arg4: memref<1x128xf32, #tpu.memory_space<vmem>>, %arg5: memref<1x1x8x64xf32, #tpu.memory_space<vmem>>) attributes {dimension_semantics = [#tpu.dimension_semantics<parallel>, #tpu.dimension_semantics<parallel>], iteration_bounds = array<i64: 2, 8>, scalar_prefetch = 0 : i64, scratch_operands = 0 : i64, tpu.core_type = #tpu.core_type<tc>, window_params = [{transform_indices = @transform_0, window_bounds = array<i64: 1, 2, 16, 128>}, {pipeline_mode = #tpu.pipeline_mode<synchronous>, transform_indices = @transform_1, window_bounds = array<i64: 1, 128>}, {pipeline_mode = #tpu.pipeline_mode<synchronous>, transform_indices = @transform_2, window_bounds = array<i64: 1, 128>}, {transform_indices = @transform_3, window_bounds = array<i64: 1, 1, 8, 64>}]} {
    %c0 = arith.constant 0 : index
    %c0_0 = arith.constant 0 : index
    %c0_1 = arith.constant 0 : index
    %c0_2 = arith.constant 0 : index
    %0 = vector.load %arg2[%c0, %c0_0, %c0_1, %c0_2] : memref<1x2x16x128xf32, #tpu.memory_space<vmem>>, vector<1x2x16x128xf32>
    %1 = vector.shape_cast %0 : vector<1x2x16x128xf32> to vector<2x16x128xf32>
    %c0_3 = arith.constant 0 : index
    %c0_4 = arith.constant 0 : index
    %2 = vector.load %arg3[%c0_3, %c0_4] : memref<1x128xf32, #tpu.memory_space<vmem>>, vector<1x128xf32>
    %3 = vector.shape_cast %2 : vector<1x128xf32> to vector<1x1x128xf32>
    %4 = vector.broadcast %3 : vector<1x1x128xf32> to vector<2x16x128xf32>
    %5 = arith.mulf %1, %4 : vector<2x16x128xf32>
    %c0_5 = arith.constant 0 : index
    %c0_6 = arith.constant 0 : index
    %6 = vector.load %arg4[%c0_5, %c0_6] : memref<1x128xf32, #tpu.memory_space<vmem>>, vector<1x128xf32>
    %7 = vector.shape_cast %6 : vector<1x128xf32> to vector<1x1x128xf32>
    %8 = vector.broadcast %7 : vector<1x1x128xf32> to vector<2x16x128xf32>
    %9 = arith.addf %5, %8 : vector<2x16x128xf32>
    %cst = arith.constant 0.000000e+00 : f32
    %10 = vector.broadcast %cst : f32 to vector<2x16x128xf32>
    %11 = arith.maximumf %9, %10 : vector<2x16x128xf32>
    %12 = vector.extract_strided_slice %11 {offsets = [0, 0, 0], sizes = [1, 16, 128], strides = [1, 1, 1]} : vector<2x16x128xf32> to vector<1x16x128xf32>
    %13 = vector.shape_cast %12 : vector<1x16x128xf32> to vector<16x128xf32>
    %14 = vector.extract_strided_slice %11 {offsets = [1, 0, 0], sizes = [1, 16, 128], strides = [1, 1, 1]} : vector<2x16x128xf32> to vector<1x16x128xf32>
    %15 = vector.shape_cast %14 : vector<1x16x128xf32> to vector<16x128xf32>
    %16 = arith.maximumf %13, %15 : vector<16x128xf32>
    %17 = vector.shape_cast %16 : vector<16x128xf32> to vector<8x2x128xf32>
    %18 = vector.extract_strided_slice %17 {offsets = [0, 0, 0], sizes = [8, 1, 128], strides = [1, 1, 1]} : vector<8x2x128xf32> to vector<8x1x128xf32>
    %19 = vector.shape_cast %18 : vector<8x1x128xf32> to vector<8x128xf32>
    %20 = vector.extract_strided_slice %17 {offsets = [0, 1, 0], sizes = [8, 1, 128], strides = [1, 1, 1]} : vector<8x2x128xf32> to vector<8x1x128xf32>
    %21 = vector.shape_cast %20 : vector<8x1x128xf32> to vector<8x128xf32>
    %22 = arith.maximumf %19, %21 : vector<8x128xf32>
    %23 = vector.shape_cast %22 : vector<8x128xf32> to vector<8x8x16xf32>
    %24 = vector.extract_strided_slice %23 {offsets = [0, 0, 0], sizes = [8, 8, 8], strides = [1, 1, 1]} : vector<8x8x16xf32> to vector<8x8x8xf32>
    %25 = vector.extract_strided_slice %23 {offsets = [0, 0, 8], sizes = [8, 8, 8], strides = [1, 1, 1]} : vector<8x8x16xf32> to vector<8x8x8xf32>
    %26 = arith.maximumf %24, %25 : vector<8x8x8xf32>
    %27 = vector.shape_cast %26 : vector<8x8x8xf32> to vector<8x64xf32>
    %c0_7 = arith.constant 0 : index
    %c0_8 = arith.constant 0 : index
    %c0_9 = arith.constant 0 : index
    %c0_10 = arith.constant 0 : index
    %28 = vector.load %arg5[%c0_7, %c0_8, %c0_9, %c0_10] : memref<1x1x8x64xf32, #tpu.memory_space<vmem>>, vector<1x1x8x64xf32>
    %29 = vector.shape_cast %28 : vector<1x1x8x64xf32> to vector<8x64xf32>
    %30 = vector.shape_cast %27 : vector<8x64xf32> to vector<1x1x8x64xf32>
    tpu.vector_store %arg5[%c0_7, %c0_8, %c0_9, %c0_10], %30 {strides = array<i32>} : memref<1x1x8x64xf32, #tpu.memory_space<vmem>>, vector<1x1x8x64xf32>,
    return
  }
  func.func @transform_0(%arg0: i32, %arg1: i32) -> (i32, i32, i32, i32) {
    %c0_i32 = arith.constant 0 : i32
    %c0_i32_0 = arith.constant 0 : i32
    %c0_i32_1 = arith.constant 0 : i32
    return %arg0, %arg1, %c0_i32, %c0_i32_0 : i32, i32, i32, i32
  }
  func.func @transform_1(%arg0: i32, %arg1: i32) -> (i32, i32) {
    %c0_i32 = arith.constant 0 : i32
    %c0_i32_0 = arith.constant 0 : i32
    %c0_i32_1 = arith.constant 0 : i32
    return %c0_i32, %c0_i32_0 : i32, i32
  }
  func.func @transform_2(%arg0: i32, %arg1: i32) -> (i32, i32) {
    %c0_i32 = arith.constant 0 : i32
    %c0_i32_0 = arith.constant 0 : i32
    %c0_i32_1 = arith.constant 0 : i32
    return %c0_i32, %c0_i32_0 : i32, i32
  }
  func.func @transform_3(%arg0: i32, %arg1: i32) -> (i32, i32, i32, i32) {
    %c0_i32 = arith.constant 0 : i32
    %c0_i32_0 = arith.constant 0 : i32
    %c0_i32_1 = arith.constant 0 : i32
    return %arg0, %arg1, %c0_i32, %c0_i32_0 : i32, i32, i32, i32
  }
}

</mosaic_0001>

<bundles_post_ra>
// kernel: tile.33
= control target key start
LH: loop header
LB: loop body
LE: loop exit
PB: predicated region body
PF: predicated region fallthrough
CT: control target
= control target key end

     0   :  { %s28_s0 = inlined_call_operand.vmem [shape: f32[4], index: 0, kind: input, shape index: {}]   ;;  %s29_s1 = inlined_call_operand.vmem [shape: f32[16,4], index: 1, kind: output, shape index: {}]  }
   0x1   :  { %v4_v0 = vld [vmem:[%s28_s0] ss:$0 sm:$0xff] }
   0x2   :  { %5 = vst [vmem:[%s29_s1] sm:$0xff] %v4_v0  ;;  %8 = vst [vmem:[%s29_s1 + $0x8] sm:$0xff] %v4_v0 }

// kernel: tile.34
= control target key start
LH: loop header
LB: loop body
LE: loop exit
PB: predicated region body
PF: predicated region fallthrough
CT: control target
= control target key end

     0   :  { %s131_s10 = smov 60   ;;  %s132_s11 = smov 52   ;;  %vm3_vm0 = vcmask 31744   ;;  %vm9_vm1 = vcmask 523744   ;;  %vm15_vm2 = vcmask 490944   ;;  %vm21_vm3 = vcmask 458144   ;;  %s207_s0 = inlined_call_operand.vmem [shape: f32[16,4], index: 0, kind: input, shape index: {}]   ;;  %s208_s1 = inlined_call_operand.vmem [shape: f32[1,64], index: 1, kind: output, shape index: {}]  }
   0x1   :  { %v101_v0 = vld [vmem:[%s207_s0 + $0xf] sm:$0x1]   ;;  %v103_v1 = vld [vmem:[%s207_s0 + $0xd] sm:$0x1]   ;;  %v102_v2 = vld [vmem:[%s207_s0 + $0xe] sm:$0x1]  }
   0x2   :  { %7 = vrot.lane.b32.xlu0 %v101_v0, %s131_s10  ;;  %19 = vrot.lane.b32.xlu1 %v103_v1, %s132_s11  ;;  %v104_v3 = vld [vmem:[%s207_s0 + $0xc] sm:$0x1]   ;;  %s133_s16 = smov 56   ;;  %s134_s17 = smov 48   ;;  %v105_v4 = vld [vmem:[%s207_s0 + $0xb] sm:$0x1]  }
   0x3   :  { %v106_v5 = vld [vmem:[%s207_s0 + $0xa] sm:$0x1]   ;;  %v2_v6 = vld [vmem:[%s207_s0] sm:$0x1]   ;;  %s135_s24 = smov 44   ;;  %s136_s25 = smov 40  }
   0x4   :  { %4 = vst.msk [vmem:[#allocation0] sm:$0x1] %vm3_vm0, %v2_v6   ;;  %v107_v7 = vld [vmem:[%s207_s0 + $0x9] sm:$0x1]   ;;  %v108_v8 = vld [vmem:[%s207_s0 + $0x8] sm:$0x1]  }
   0x5   :  { %s137_s30 = smov 36   ;;  %s138_s2 = smov 32   ;;  %v109_v9 = vld [vmem:[%s207_s0 + $0x7] sm:$0x1]   ;;  %v110_v10 = vld [vmem:[%s207_s0 + $0x6] sm:$0x1]  }
   0x6   :  { %13 = vrot.lane.b32.xlu0 %v102_v2, %s133_s16  ;;  %25 = vrot.lane.b32.xlu1 %v104_v3, %s134_s17  ;;  %s139_s7 = smov 28   ;;  %s140_s8 = smov 24   ;;  %v111_v11 = vld [vmem:[%s207_s0 + $0x5] sm:$0x1]   ;;  %v112_v12 = vld [vmem:[%s207_s0 + $0x4] sm:$0x1]  }
   0x7   :  { %s141_s13 = smov 20   ;;  %s142_s14 = smov 16   ;;  %v113_v13 = vld [vmem:[%s207_s0 + $0x3] sm:$0x1]   ;;  %v114_v14 = vld [vmem:[%s207_s0 + $0x2] sm:$0x1]  }
   0x8   :  { %s143_s19 = smov 12   ;;  %s144_s20 = smov 8   ;;  %v115_v15 = vld [vmem:[%s207_s0 + $0x1] sm:$0x1]   ;;  %vm27_vm4 = vcmask 425344   ;;  %vm33_vm5 = vcmask 392544  }
   0x9   :  { %s145_s0 = smov 4   ;;  %vm39_vm6 = vcmask 359744   ;;  %vm45_vm7 = vcmask 326944   ;;  %vm51_vm8 = vcmask 294144   ;;  %vm57_vm9 = vcmask 261344  }
   0xa   :  { %31 = vrot.lane.b32.xlu0 %v105_v4, %s135_s24  ;;  %37 = vrot.lane.b32.xlu1 %v106_v5, %s136_s25  ;;  %vm63_vm10 = vcmask 228544   ;;  %vm69_vm11 = vcmask 195744   ;;  %vm75_vm12 = vcmask 162944   ;;  %vm81_vm13 = vcmask 130144  }
   0xb   :  { %vm87_vm14 = vcmask 97344   ;;  %vm93_vm15 = vcmask 64544  }
   0xe   :  { %43 = vrot.lane.b32.xlu0 %v107_v7, %s137_s30  ;;  %49 = vrot.lane.b32.xlu1 %v108_v8, %s138_s2 }
  0x12   :  { %55 = vrot.lane.b32.xlu0 %v109_v9, %s139_s7  ;;  %61 = vrot.lane.b32.xlu1 %v110_v10, %s140_s8 }
  0x16   :  { %67 = vrot.lane.b32.xlu0 %v111_v11, %s141_s13  ;;  %73 = vrot.lane.b32.xlu1 %v112_v12, %s142_s14 }
  0x1a   :  { %79 = vrot.lane.b32.xlu0 %v113_v13, %s143_s19  ;;  %85 = vrot.lane.b32.xlu1 %v114_v14, %s144_s20 }
  0x1e   :  { %91 = vrot.lane.b32.xlu0 %v115_v15, %s145_s0 }
  0x74   :  { %v8_v16 = vpop.permute.xlu0 %7   ;;  %v20_v17 = vpop.permute.xlu1 %19  }
  0x75   :  { %10 = vst.msk [vmem:[#allocation0] sm:$0x1] %vm9_vm1, %v8_v16  }
  0x78   :  { %v14_v18 = vpop.permute.xlu0 %13   ;;  %v26_v19 = vpop.permute.xlu1 %25  }
  0x79   :  { %16 = vst.msk [vmem:[#allocation0] sm:$0x1] %vm15_vm2, %v14_v18  }
  0x7a   :  { %22 = vst.msk [vmem:[#allocation0] sm:$0x1] %vm21_vm3, %v20_v17  }
  0x7b   :  { %28 = vst.msk [vmem:[#allocation0] sm:$0x1] %vm27_vm4, %v26_v19  }
  0x7c   :  { %v32_v20 = vpop.permute.xlu0 %31   ;;  %v38_v21 = vpop.permute.xlu1 %37  }
  0x7d   :  { %34 = vst.msk [vmem:[#allocation0] sm:$0x1] %vm33_vm5, %v32_v20  }
  0x7e   :  { %40 = vst.msk [vmem:[#allocation0] sm:$0x1] %vm39_vm6, %v38_v21  }
  0x80   :  { %v44_v22 = vpop.permute.xlu0 %43   ;;  %v50_v23 = vpop.permute.xlu1 %49  }
  0x81   :  { %46 = vst.msk [vmem:[#allocation0] sm:$0x1] %vm45_vm7, %v44_v22  }
  0x82   :  { %52 = vst.msk [vmem:[#allocation0] sm:$0x1] %vm51_vm8, %v50_v23  }
  0x84   :  { %v56_v24 = vpop.permute.xlu0 %55   ;;  %v62_v25 = vpop.permute.xlu1 %61  }
  0x85   :  { %58 = vst.msk [vmem:[#allocation0] sm:$0x1] %vm57_vm9, %v56_v24  }
  0x86   :  { %64 = vst.msk [vmem:[#allocation0] sm:$0x1] %vm63_vm10, %v62_v25  }
  0x88   :  { %v68_v26 = vpop.permute.xlu0 %67   ;;  %v74_v27 = vpop.permute.xlu1 %73  }
  0x89   :  { %70 = vst.msk [vmem:[#allocation0] sm:$0x1] %vm69_vm11, %v68_v26  }
  0x8a   :  { %76 = vst.msk [vmem:[#allocation0] sm:$0x1] %vm75_vm12, %v74_v27  }
  0x8c   :  { %v80_v28 = vpop.permute.xlu0 %79   ;;  %v86_v29 = vpop.permute.xlu1 %85  }
  0x8d   :  { %82 = vst.msk [vmem:[#allocation0] sm:$0x1] %vm81_vm13, %v80_v28  }
  0x8e   :  { %88 = vst.msk [vmem:[#allocation0] sm:$0x1] %vm87_vm14, %v86_v29  }
  0x90   :  { %v92_v30 = vpop.permute.xlu0 %91  }
  0x91   :  { %94 = vst.msk [vmem:[#allocation0] sm:$0x1] %vm93_vm15, %v92_v30  }
  0x98   :  { %v98_v31 = vld [vmem:[#allocation0] sm:$0x1] }
  0x99   :  { %100 = vst [vmem:[%s208_s1] sm:$0x1] %v98_v31 }

// kernel: conv3d_block_forward.3
= control target key start
LH: loop header
LB: loop body
LE: loop exit
PB: predicated region body
PF: predicated region fallthrough
CT: control target
= control target key end

     0   :  { %s1234_s18 = smov 0   ;;  %s1236_s19 = smov 0   ;;  %s1395_s0 = inlined_call_operand.vmem [shape: f32[2,16,16,64], index: 0, kind: input, shape index: {}]   ;;  %s1396_s1 = inlined_call_operand.vmem [shape: bf16[9,72,64], index: 1, kind: input, shape index: {}]   ;;  %s1397_s2 = inlined_call_operand.vmem [shape: f32[1,64], index: 2, kind: input, shape index: {}]   ;;  %s1398_s3 = inlined_call_operand.vmem [shape: f32[2,16,16,64], index: 3, kind: output, shape index: {0}]   ;;  %s1399_s4 = inlined_call_operand.vmem [shape: f32[2,16,1,64], index: 4, kind: output, shape index: {1}]   ;;  %s1400_s5 = inlined_call_operand.vmem [shape: f32[2,16,1,64], index: 5, kind: output, shape index: {2}]  }
   0x1   :  { %s1238_s20 = smov 0   ;;  %s1240_s21 = smov 0  }
   0x2   :  { %s1242_s22 = smov 0   ;;  %s1244_s23 = smov 0  }
   0x3   :  { %s1246_s24 = smov 0  }
   0x4 LB: > { %1402 = sst [smem:[#allocation3_spill]] %s1194_s23  ;;  %s28_s25 = sadd.s32 1, %s1186_s21  ;;  %s1198_s24 = sphi %s1246_s24, %s16_s24   ;;  %s1194_s23 = sphi %s1244_s23, %s1409_s23   ;;  %s1190_s22 = sphi %s1242_s22, %s1413_s22   ;;  %s1186_s21 = sphi %s1240_s21, %s1412_s21   ;;  %s1182_s20 = sphi %s1238_s20, %s1406_s20   ;;  %s1178_s19 = sphi %s1236_s19, %s1411_s19   ;;  %s1174_s18 = sphi %s1234_s18, %s1410_s18  }
   0x5   : > { %p29_p0 = scmp.ge.s32.totalorder %s28_s25, 3  ;;  %s31_s26 = sadd.s32 1, %s1190_s22 }
   0x6   : > { %p936_p1 = scmp.ge.s32.totalorder %s1198_s24, 1  ;;  %p247_p2 = scmp.lt.s32.totalorder %s1198_s24, 97 }
   0x7   : > { %s1415_s25 = smov (%p29_p0, %s28_s25), 0  ;;  %s1417_s26 = smov (!%p29_p0, %s31_s26), %s1190_s22 }
   0x8   : > { %1403 = sst [smem:[#allocation4_spill]] %s1415_s25  ;;  %p248_p3 = pnand %p936_p1, %p247_p2 }
   0x9   : > { %p33_p4 = scmp.ge.s32.totalorder %s1417_s26, 16  ;;  %s35_s27 = sadd.s32 1, %s1194_s23 }
   0xa   : > { %251 = sbr.rel (%p248_p3) target bundleno = 436 (0x1b4), region = 32  ;;  %s303_s28 = sadd.s32 (!%p248_p3), %s1174_s18, %s1178_s19 }
   0xb   : > { %s1419_s26 = smov (%p33_p4, %s1417_s26), 0  ;;  %s1421_s27 = smov (!%p33_p4, %s35_s27), %s1194_s23 }
   0xc   : > { %1404 = sst [smem:[#allocation5_spill]] %s1419_s26  ;;  %p37_p5 = scmp.ge.s32.totalorder %s1421_s27, 2 }
   0xd   : > { %p309_p6 = scmp.lt.s32.totalorder (!%p248_p3), %s1182_s20, 1  ;;  %s1282_s29 = sadd.s32 (!%p248_p3), 4294967295, %s303_s28 }
   0xe   : > { %s1423_s27 = smov (%p37_p5, %s1421_s27), 0  ;;  %p326_p7 = scmp.lt.s32.totalorder (!%p248_p3), %s1178_s19, 15 }
   0xf   : > { %1405 = sst [smem:[#allocation6_spill]] %s1423_s27  ;;  %p305_p8 = scmp.lt.s32.totalorder (!%p248_p3), %s1282_s29, 15 }
  0x10   : > { %p938_p9 = scmp.gt.s32.totalorder (!%p248_p3), %s1282_s29, 0  ;;  %p951_p11 = scmp.ne.s32.totalorder (!%p248_p3), %s1174_s18, 0 }
  0x11   : > { %s1425_s20 = smov (!%p309_p6, %s1182_s20), 1  ;;  %s1429_s19 = smov (!%p326_p7, %s1178_s19), 15 }
  0x12   : > { %s306_s30 = scalar_select %p305_p8, %s1282_s29, 15 }
  0x13   : > { %s949_s6 = sshll.u32 %s1425_s20, 4  ;;  %s944_s7 = sshll.u32 %s1425_s20, 5  ;;  %vm352_vm0 = vcmask (!%p951_p11), 523264   ;;  %v1200_v0 = vmov (!%p951_p11), 0.0  }
  0x14   : > { %s1427_s30 = smov (!%p938_p9, %s306_s30), 0  ;;  %s946_s8 = sshll.u32 %s1429_s19, 1  ;;  %353 = vst.msk [vmem:[#allocation2] sm:$0xff] (!%p951_p11), %vm352_vm0, %v1200_v0  ;;  %354 = vst.msk [vmem:[#allocation2 + $0x8] sm:$0xff] (!%p951_p11), %vm352_vm0, %v1200_v0 }
  0x15   : > { %p311_p10 = scmp.lt.s32.totalorder %s1427_s30, 15  ;;  %s1289_s9 = sadd.s32 %s949_s6, %s1429_s19 }
  0x16   : > { %s330_s10 = sadd.s32 %s946_s8, %s944_s7  ;;  %s339_s13 = scalar_lea.vmem %s1399_s4, %s1289_s9 }
  0x17   : > { %s1431_s30 = smov (!%p311_p10, %s1427_s30), 15  ;;  %s948_s15 = sshll.u32 %s330_s10, 3 }
  0x18   : > { %s943_s14 = sshll.u32 %s1431_s30, 1  ;;  %s1298_s27 = scalar_lea.vmem %s1398_s3, %s948_s15 }
  0x19   : > { %s315_s16 = sadd.s32 %s944_s7, %s943_s14  ;;  %s346_s6 = scalar_lea.vmem %s1400_s5, %s1289_s9 }
  0x1a   : > { %s945_s20 = sshll.u32 %s315_s16, 3  ;;  %351 = sbr.rel (%p951_p11) target bundleno = 33 (0x21), region = 36 }
  0x1b   : > { %s317_s8 = scalar_lea.vmem %s1395_s0, %s945_s20 }
  0x21 PF: > { %p357_p12 = scmp.ge.s32.totalorder %s1282_s29, 0  ;;  %p358_p13 = scmp.le.s32.totalorder %s1282_s29, 15 }
  0x23   : > { %p359_p0 = pnand %p358_p13, %p357_p12 }
  0x24   : > { %v363_v1 = vld [vmem:[%s317_s8] sm:$0xff] (!%p359_p0)  ;;  %v364_v2 = vld [vmem:[%s317_s8 + $0x8] sm:$0xff] (!%p359_p0)  ;;  %vm367_vm1 = vcmask (!%p359_p0), 1040384   ;;  %s1003_s23 = smul.u32 (!%p359_p0), 108, %s1174_s18  ;;  %v1201_v5 = vmov (!%p359_p0), 0.0   ;;  %vm1202_vm2 = vmmov (!%p359_p0), 0  }
  0x25   : > { %362 = sbr.rel (%p359_p0) target bundleno = 409 (0x199), region = 40  ;;  %v368_v3 = vrot.slane (!%p359_p0), %v363_v1, 7  ;;  %v369_v4 = vrot.slane (!%p359_p0), %v364_v2, 7  ;;  %1036 = vmatprep.subr.bf16.mxu1 (!%p359_p0), %v1201_v5  ;;  %1022 = vmatprep.subr.bf16.mxu0 (!%p359_p0), %v1201_v5  ;;  %s1203_s29 = smov (!%p359_p0), 4   ;;  %vm466_vm3 = vcmask (!%p359_p0), 1043456   ;;  %vm386_vm4 = vcmask (!%p359_p0), 31744  }
  0x26   : > { %s1316_s30 = scalar_lea.vmem (!%p359_p0), %s1396_s1, %s1003_s23  ;;  %1046 = vmatprep.mubr.msk.bf16.mxu1 (!%p359_p0), %vm1202_vm2, %v1201_v5  ;;  %1032 = vmatprep.mubr.msk.bf16.mxu0 (!%p359_p0), %vm1202_vm2, %v1201_v5  ;;  %vm390_vm5 = vcmask (!%p359_p0), 556032   ;;  %vm462_vm6 = vcmask (!%p359_p0), 588800   ;;  %vm422_vm7 = vsmask.f32 (!%p359_p0), 7424  ;;  %vm599_vm8 = vcmask (!%p359_p0), 1046528   ;;  %v679_v61 = vld [vmem:[#allocation2] sm:$0xff] (!%p359_p0) }
  0x27   : > { %v370_v6 = vsel (!%p359_p0), %vm367_vm1, %v368_v3, %v369_v4  ;;  %v373_v7 = vsel (!%p359_p0), %vm367_vm1, 0.0, %v368_v3  ;;  %v1129_v9 = vld [vmem:[%s1316_s30] sm:$0xff] (!%p359_p0)   ;;  %v1130_v10 = vld [vmem:[%s1316_s30 + $0x8] sm:$0xff] (!%p359_p0)   ;;  %v374_v12 = vsel (!%p359_p0), %vm367_vm1, %v369_v4, 0.0  ;;  %v1132_v14 = vld [vmem:[%s1316_s30 + $0x10] sm:$0xff] (!%p359_p0)   ;;  %vm683_vm9 = vcmask (!%p359_p0), 523264  }
  0x28   : > { %v1124_v8 = vpack.i.bf16 (!%p359_p0), %v370_v6, %v373_v7  ;;  %1037 = vmatpush3.bf16.msra.mxu1 (!%p359_p0), %v1129_v9  ;;  %v1131_v11 = vld [vmem:[%s1316_s30 + $0x24] sm:$0xff] (!%p359_p0)   ;;  %v1133_v13 = vld [vmem:[%s1316_s30 + $0x2c] sm:$0xff] (!%p359_p0)   ;;  %v1135_v15 = vld [vmem:[%s1316_s30 + $0x34] sm:$0xff] (!%p359_p0)  }
  0x29   : > { %1038 = vmatprep.subr.bf16.mxu1 (!%p359_p0), %v1201_v5  ;;  %1023 = vmatpush3.bf16.msra.mxu0 (!%p359_p0), %v1131_v11  ;;  %v1134_v16 = vld [vmem:[%s1316_s30 + $0x18] sm:$0xff] (!%p359_p0)   ;;  %v1136_v17 = vld [vmem:[%s1316_s30 + $0x20] ss:$0 sps:$4 sm:$0xff] (!%p359_p0)   ;;  %v1138_v19 = vld [vmem:[%s1316_s30 + $0x44] ss:$0 sps:$4 sm:$0xff] (!%p359_p0)  }
  0x2a   : > { %1125 = vrot.lane.b32.xlu0 (!%p359_p0), %v1124_v8, %s1203_s29  ;;  %1024 = vmatprep.subr.bf16.mxu0 (!%p359_p0), %v1201_v5  ;;  %v1137_v18 = vld [vmem:[%s1316_s30 + $0x3c] sm:$0xff] (!%p359_p0)   ;;  %v541_v20 = vsel (!%p359_p0), %vm466_vm3, %v1136_v17, 0  ;;  %v1143_v21 = vld [vmem:[%s1316_s30 + $0x68] ss:$0 sps:$4 sm:$0xff] (!%p359_p0)   ;;  %v468_v22 = vsel (!%p359_p0), %vm466_vm3, %v1138_v19, 0  ;;  %v1140_v44 = vld [vmem:[%s1316_s30 + $0x50] sm:$0xff] (!%p359_p0)  }
  0x2b   : > { %v634_v23 = vsel (!%p359_p0), %vm466_vm3, %v1143_v21, 0  ;;  %v1139_v42 = vld [vmem:[%s1316_s30 + $0x48] sm:$0xff] (!%p359_p0)   ;;  %v1141_v45 = vld [vmem:[%s1316_s30 + $0x58] sm:$0xff] (!%p359_p0)   ;;  %v1142_v46 = vld [vmem:[%s1316_s30 + $0x60] sm:$0xff] (!%p359_p0)  }
  0x2c   : > { %1039 = vmatpush3.bf16.msra.mxu1 %v1130_v10  ;;  %v680_v1 = vld [vmem:[#allocation2 + $0x8] sm:$0xff] }
  0x2d   : > { %1040 = vmatprep.subr.bf16.mxu1 %v1201_v5  ;;  %1025 = vmatpush3.bf16.msra.mxu0 %v1133_v13 }
  0x2e   : > { %381 = vrot.lane.b32.xlu0 %v374_v12, %s1203_s29  ;;  %1026 = vmatprep.subr.bf16.mxu0 %v1201_v5 }
  0x30   : > { %1041 = vmatpush3.bf16.msra.mxu1 %v1132_v14 }
  0x31   : > { %1042 = vmatprep.subr.bf16.mxu1 %v1201_v5  ;;  %1027 = vmatpush3.bf16.msra.mxu0 %v1135_v15 }
  0x32   : > { %1028 = vmatprep.subr.bf16.mxu0 %v1201_v5 }
  0x34   : > { %1043 = vmatpush3.bf16.msra.mxu1 %v1134_v16 }
  0x35   : > { %1044 = vmatprep.subr.bf16.mxu1 %v1201_v5  ;;  %1029 = vmatpush3.bf16.msra.mxu0 %v1137_v18 }
  0x36   : > { %1030 = vmatprep.subr.bf16.mxu0 %v1201_v5 }
  0x38   : > { %1045 = vmatpush3.bf16.msra.mxu1 %v541_v20 }
  0x39   : > { %1031 = vmatpush3.bf16.msra.mxu0 %v468_v22 }
  0x3a   : > { %1050 = vmatprep.subr.bf16.mxu0 %v1201_v5 }
  0x9c   : > { %v1126_v24 = vpop.permute.xlu0 %1125 }
  0x9d   : > { %v1128_v25 = vunpack.i.h.bf16 %v1126_v24  ;;  %v1127_v26 = vunpack.i.l.bf16 %v1126_v24 }
  0x9f   : > { %v387_v27 = vsel %vm386_vm4, 0.0, %v1127_v26  ;;  %v388_v28 = vsel %vm386_vm4, 0.0, %v1128_v25 }
  0xa0   : > { %v382_v29 = vpop.permute.xlu0 %381  ;;  %v391_v30 = vsel %vm390_vm5, %v387_v27, 0.0  ;;  %v392_v31 = vsel %vm390_vm5, %v388_v28, 0.0 }
  0xa1   : > { %v389_v32 = vsel %vm386_vm4, 0.0, %v382_v29  ;;  %v394_v33 = vpack.c.bf16 %v392_v31, %v391_v30 }
  0xa2   : > { %v393_v34 = vsel %vm390_vm5, %v389_v32, 0.0 }
  0xa3   : > { %v408_v35 = vpack.c.bf16 %v393_v34, %v393_v34  ;;  %1047 = vmatmul.mubr.msk.bf16.vlgmr.msra.gmra.mrb[0].mxu1 %vm462_vm6, %v394_v33  ;;  %v426_v36 = vshll.u32 %v394_v33, 16  ;;  %v424_v38 = vshrl.u32 %v394_v33, 16  ;;  %v600_v48 = vrot.slane %v394_v33, 1 }
  0xa5   : > { %v431_v37 = vshll.u32 %v408_v35, 16  ;;  %v428_v39 = vrot.slane %v426_v36, 1  ;;  %v601_v47 = vrot.slane %v408_v35, 1 }
  0xa7   : > { %v433_v40 = vrot.slane %v431_v37, 1  ;;  %v429_v41 = vor.u32 %v428_v39, %v424_v38  ;;  %v602_v49 = vsel %vm599_vm8, %v600_v48, %v601_v47 }
  0xa9   : > { %v434_v43 = vsel %vm422_vm7, %v429_v41, %v433_v40 }
  0xaa   : > { %1033 = vmatmul.mubr.msk.bf16.vlgmr.msra.gmra.mrb[0].mxu0 %vm462_vm6, %v434_v43 }
  0xab   : > { %1051 = vmatpush3.bf16.msra.mxu0 %v1139_v42  ;;  %1060 = vmatprep.mubr.msk.bf16.mxu0 %vm1202_vm2, %v1201_v5 }
  0xac   : > { %1052 = vmatprep.subr.bf16.mxu0 %v1201_v5 }
  0xaf   : > { %1053 = vmatpush3.bf16.msra.mxu0 %v1140_v44 }
  0xb0   : > { %1054 = vmatprep.subr.bf16.mxu0 %v1201_v5 }
  0xb3   : > { %1055 = vmatpush3.bf16.msra.mxu0 %v1141_v45 }
  0xb4   : > { %1056 = vmatprep.subr.bf16.mxu0 %v1201_v5 }
  0xb7   : > { %1057 = vmatpush3.bf16.msra.mxu0 %v1142_v46 }
  0xb8   : > { %1058 = vmatprep.subr.bf16.mxu0 %v1201_v5 }
  0xbb   : > { %1059 = vmatpush3.bf16.msra.mxu0 %v634_v23 }
  0xbe   : > { %1061 = vmatmul.mubr.msk.bf16.vlgmr.msra.gmra.mrb[4].mxu0 %vm462_vm6, %v602_v49 }
 0x176   : > { %v577_v50 = vpop.f32.mrb[0].mxu1 }
 0x177   : > { %v1048_v51 = vpop.f32.mrb[1].mxu1 }
 0x178   : > { %v580_v52 = vpop.f32.mrb[2].mxu1 }
 0x179   : > { %v1049_v53 = vpop.f32.mrb[3].mxu1 }
 0x17d   : > { %v504_v54 = vpop.f32.mrb[0].mxu0 }
 0x17e   : > { %v578_v55 = vadd.f32 %v577_v50, %v504_v54  ;;  %v1034_v56 = vpop.f32.mrb[1].mxu0 }
 0x17f   : > { %v507_v57 = vpop.f32.mrb[2].mxu0 }
 0x180   : > { %v581_v58 = vadd.f32 %v580_v52, %v507_v57  ;;  %v1035_v59 = vpop.f32.mrb[3].mxu0 }
 0x191   : > { %v670_v60 = vpop.f32.mrb[4].mxu0 }
 0x192   : > { %v677_v62 = vadd.f32 %v670_v60, %v578_v55  ;;  %v1062_v63 = vpop.f32.mrb[5].mxu0 }
 0x193   : > { %v673_v0 = vpop.f32.mrb[6].mxu0 }
 0x194   : > { %v681_v2 = vadd.f32 %v679_v61, %v677_v62  ;;  %v678_v3 = vadd.f32 %v673_v0, %v581_v58  ;;  %v1063_v4 = vpop.f32.mrb[7].mxu0 }
 0x196   : > { %684 = vst.msk [vmem:[#allocation2] sm:$0xff] %vm683_vm9, %v681_v2  ;;  %v682_v5 = vadd.f32 %v680_v1, %v678_v3 }
 0x198   : > { %685 = vst.msk [vmem:[#allocation2 + $0x8] sm:$0xff] %vm683_vm9, %v682_v5 }
 0x199 PF: > { %p993_p1 = scmp.ne.s32.totalorder %s1174_s18, 2 }
 0x19a   : > { %v994_v7 = vld [vmem:[%s1397_s2] ss:$0 sm:$0xff] (!%p993_p1)  ;;  %vm701_vm10 = vcmask (!%p993_p1), 523264   ;;  %vm713_vm11 = vcmask (!%p993_p1), 516096  }
 0x19b   : > { %689 = sbr.rel (%p993_p1) target bundleno = 436 (0x1b4), region = 44 }
 0x19d   : > { %v690_v6 = vld [vmem:[#allocation2] sm:$0xff] (!%p993_p1) }
 0x19e   : > { %v699_v9 = vadd.f32 (!%p993_p1), %v994_v7, %v690_v6 }
 0x19f   : > { %v691_v8 = vld [vmem:[#allocation2 + $0x8] sm:$0xff] (!%p993_p1) }
 0x1a0   : > { %v700_v10 = vadd.f32 (!%p993_p1), %v994_v7, %v691_v8  ;;  %702 = vst.msk [vmem:[%s1298_s27] sm:$0xff] (!%p993_p1), %vm701_vm10, %v699_v9  ;;  %v715_v11 = vmul.f32 (!%p993_p1), %v699_v9, %v699_v9  ;;  %v704_v13 = vsel (!%p993_p1), %vm701_vm10, %v699_v9, 0.0 }
 0x1a2   : > { %703 = vst.msk [vmem:[%s1298_s27 + $0x8] sm:$0xff] %vm701_vm10, %v700_v10  ;;  %v716_v12 = vmul.f32 %v700_v10, %v700_v10  ;;  %v705_v14 = vsel %vm701_vm10, %v700_v10, 0.0  ;;  %v717_v16 = vsel %vm701_vm10, %v715_v11, 0.0 }
 0x1a3   : > { %v706_v15 = vadd.f32 %v705_v14, %v704_v13 }
 0x1a4   : > { %v718_v17 = vsel %vm701_vm10, %v716_v12, 0.0 }
 0x1a5   : > { %v707_v18 = vrot.slane %v706_v15, 4  ;;  %v719_v19 = vadd.f32 %v718_v17, %v717_v16 }
 0x1a7   : > { %v708_v20 = vadd.f32 %v707_v18, %v706_v15  ;;  %v720_v21 = vrot.slane %v719_v19, 4 }
 0x1a9   : > { %v709_v22 = vrot.slane %v708_v20, 2  ;;  %v721_v23 = vadd.f32 %v720_v21, %v719_v19 }
 0x1ab   : > { %v710_v24 = vadd.f32 %v709_v22, %v708_v20  ;;  %v722_v25 = vrot.slane %v721_v23, 2 }
 0x1ad   : > { %v711_v26 = vrot.slane %v710_v24, 1  ;;  %v723_v27 = vadd.f32 %v722_v25, %v721_v23 }
 0x1af   : > { %v712_v28 = vadd.f32 %v711_v26, %v710_v24  ;;  %v724_v29 = vrot.slane %v723_v27, 1 }
 0x1b1   : > { %714 = vst.msk [vmem:[%s339_s13] sm:$0x1] %vm713_vm11, %v712_v28  ;;  %v725_v30 = vadd.f32 %v724_v29, %v723_v27 }
 0x1b3   : > { %726 = vst.msk [vmem:[%s346_s6] sm:$0x1] %vm713_vm11, %v725_v30 }
 0x1b4 PF: > { %s16_s24 = sadd.s32 1, %s1198_s24   ;;  %s1406_s20 = sld [smem:[#allocation3_spill]] }
 0x1b5   : > { %p13_p2 = scmp.ge.s32.totalorder %s16_s24, 98   ;;  %s1407_s14 = sld [smem:[#allocation4_spill]] }
 0x1b6   : > { %s1408_s15 = sld [smem:[#allocation5_spill]]  ;;  %s1409_s23 = sld [smem:[#allocation6_spill]] }
 0x1b7   : > { %s1410_s18 = smov %s1186_s21  ;;  %s1411_s19 = smov %s1190_s22 }
 0x1b8   :  { %15 = sbr.rel (!%p13_p2) target bundleno = 4 (0x4), region = 101 }
 0x1bb   : > { %s1412_s21 = smov %s1407_s14 }
 0x1bc   : > { %s1413_s22 = smov %s1408_s15 }

// kernel: tile.38
= control target key start
LH: loop header
LB: loop body
LE: loop exit
PB: predicated region body
PF: predicated region fallthrough
CT: control target
= control target key end

     0   :  { %s28_s0 = inlined_call_operand.vmem [shape: f32[8], index: 0, kind: input, shape index: {}]   ;;  %s29_s1 = inlined_call_operand.vmem [shape: f32[16,8], index: 1, kind: output, shape index: {}]  }
   0x1   :  { %v4_v0 = vld [vmem:[%s28_s0] ss:$0 sm:$0xff] }
   0x2   :  { %5 = vst [vmem:[%s29_s1] sm:$0xff] %v4_v0  ;;  %8 = vst [vmem:[%s29_s1 + $0x8] sm:$0xff] %v4_v0 }

// kernel: tile.39
= control target key start
LH: loop header
LB: loop body
LE: loop exit
PB: predicated region body
PF: predicated region fallthrough
CT: control target
= control target key end

     0   :  { %s131_s10 = smov 120   ;;  %s132_s11 = smov 104   ;;  %vm3_vm0 = vcmask 64512   ;;  %vm9_vm1 = vcmask 1048512   ;;  %vm15_vm2 = vcmask 982912   ;;  %vm21_vm3 = vcmask 917312   ;;  %s207_s0 = inlined_call_operand.vmem [shape: f32[16,8], index: 0, kind: input, shape index: {}]   ;;  %s208_s1 = inlined_call_operand.vmem [shape: f32[1,128], index: 1, kind: output, shape index: {}]  }
   0x1   :  { %v101_v0 = vld [vmem:[%s207_s0 + $0xf] sm:$0x1]   ;;  %v103_v1 = vld [vmem:[%s207_s0 + $0xd] sm:$0x1]   ;;  %v102_v2 = vld [vmem:[%s207_s0 + $0xe] sm:$0x1]  }
   0x2   :  { %7 = vrot.lane.b32.xlu0 %v101_v0, %s131_s10  ;;  %19 = vrot.lane.b32.xlu1 %v103_v1, %s132_s11  ;;  %v104_v3 = vld [vmem:[%s207_s0 + $0xc] sm:$0x1]   ;;  %s133_s16 = smov 112   ;;  %s134_s17 = smov 96   ;;  %v105_v4 = vld [vmem:[%s207_s0 + $0xb] sm:$0x1]  }
   0x3   :  { %v106_v5 = vld [vmem:[%s207_s0 + $0xa] sm:$0x1]   ;;  %v2_v6 = vld [vmem:[%s207_s0] sm:$0x1]   ;;  %s135_s24 = smov 88   ;;  %s136_s25 = smov 80  }
   0x4   :  { %4 = vst.msk [vmem:[#allocation0] sm:$0x1] %vm3_vm0, %v2_v6   ;;  %v107_v7 = vld [vmem:[%s207_s0 + $0x9] sm:$0x1]   ;;  %v108_v8 = vld [vmem:[%s207_s0 + $0x8] sm:$0x1]  }
   0x5   :  { %s137_s30 = smov 72   ;;  %s138_s2 = smov 64   ;;  %v109_v9 = vld [vmem:[%s207_s0 + $0x7] sm:$0x1]   ;;  %v110_v10 = vld [vmem:[%s207_s0 + $0x6] sm:$0x1]  }
   0x6   :  { %13 = vrot.lane.b32.xlu0 %v102_v2, %s133_s16  ;;  %25 = vrot.lane.b32.xlu1 %v104_v3, %s134_s17  ;;  %s139_s7 = smov 56   ;;  %s140_s8 = smov 48   ;;  %v111_v11 = vld [vmem:[%s207_s0 + $0x5] sm:$0x1]   ;;  %v112_v12 = vld [vmem:[%s207_s0 + $0x4] sm:$0x1]  }
   0x7   :  { %s141_s13 = smov 40   ;;  %s142_s14 = smov 32   ;;  %v113_v13 = vld [vmem:[%s207_s0 + $0x3] sm:$0x1]   ;;  %v114_v14 = vld [vmem:[%s207_s0 + $0x2] sm:$0x1]  }
   0x8   :  { %s143_s19 = smov 24   ;;  %s144_s20 = smov 16   ;;  %v115_v15 = vld [vmem:[%s207_s0 + $0x1] sm:$0x1]   ;;  %vm27_vm4 = vcmask 851712   ;;  %vm33_vm5 = vcmask 786112  }
   0x9   :  { %s145_s0 = smov 8   ;;  %vm39_vm6 = vcmask 720512   ;;  %vm45_vm7 = vcmask 654912   ;;  %vm51_vm8 = vcmask 589312   ;;  %vm57_vm9 = vcmask 523712  }
   0xa   :  { %31 = vrot.lane.b32.xlu0 %v105_v4, %s135_s24  ;;  %37 = vrot.lane.b32.xlu1 %v106_v5, %s136_s25  ;;  %vm63_vm10 = vcmask 458112   ;;  %vm69_vm11 = vcmask 392512   ;;  %vm75_vm12 = vcmask 326912   ;;  %vm81_vm13 = vcmask 261312  }
   0xb   :  { %vm87_vm14 = vcmask 195712   ;;  %vm93_vm15 = vcmask 130112  }
   0xe   :  { %43 = vrot.lane.b32.xlu0 %v107_v7, %s137_s30  ;;  %49 = vrot.lane.b32.xlu1 %v108_v8, %s138_s2 }
  0x12   :  { %55 = vrot.lane.b32.xlu0 %v109_v9, %s139_s7  ;;  %61 = vrot.lane.b32.xlu1 %v110_v10, %s140_s8 }
  0x16   :  { %67 = vrot.lane.b32.xlu0 %v111_v11, %s141_s13  ;;  %73 = vrot.lane.b32.xlu1 %v112_v12, %s142_s14 }
  0x1a   :  { %79 = vrot.lane.b32.xlu0 %v113_v13, %s143_s19  ;;  %85 = vrot.lane.b32.xlu1 %v114_v14, %s144_s20 }
  0x1e   :  { %91 = vrot.lane.b32.xlu0 %v115_v15, %s145_s0 }
  0x74   :  { %v8_v16 = vpop.permute.xlu0 %7   ;;  %v20_v17 = vpop.permute.xlu1 %19  }
  0x75   :  { %10 = vst.msk [vmem:[#allocation0] sm:$0x1] %vm9_vm1, %v8_v16  }
  0x78   :  { %v14_v18 = vpop.permute.xlu0 %13   ;;  %v26_v19 = vpop.permute.xlu1 %25  }
  0x79   :  { %16 = vst.msk [vmem:[#allocation0] sm:$0x1] %vm15_vm2, %v14_v18  }
  0x7a   :  { %22 = vst.msk [vmem:[#allocation0] sm:$0x1] %vm21_vm3, %v20_v17  }
  0x7b   :  { %28 = vst.msk [vmem:[#allocation0] sm:$0x1] %vm27_vm4, %v26_v19  }
  0x7c   :  { %v32_v20 = vpop.permute.xlu0 %31   ;;  %v38_v21 = vpop.permute.xlu1 %37  }
  0x7d   :  { %34 = vst.msk [vmem:[#allocation0] sm:$0x1] %vm33_vm5, %v32_v20  }
  0x7e   :  { %40 = vst.msk [vmem:[#allocation0] sm:$0x1] %vm39_vm6, %v38_v21  }
  0x80   :  { %v44_v22 = vpop.permute.xlu0 %43   ;;  %v50_v23 = vpop.permute.xlu1 %49  }
  0x81   :  { %46 = vst.msk [vmem:[#allocation0] sm:$0x1] %vm45_vm7, %v44_v22  }
  0x82   :  { %52 = vst.msk [vmem:[#allocation0] sm:$0x1] %vm51_vm8, %v50_v23  }
  0x84   :  { %v56_v24 = vpop.permute.xlu0 %55   ;;  %v62_v25 = vpop.permute.xlu1 %61  }
  0x85   :  { %58 = vst.msk [vmem:[#allocation0] sm:$0x1] %vm57_vm9, %v56_v24  }
  0x86   :  { %64 = vst.msk [vmem:[#allocation0] sm:$0x1] %vm63_vm10, %v62_v25  }
  0x88   :  { %v68_v26 = vpop.permute.xlu0 %67   ;;  %v74_v27 = vpop.permute.xlu1 %73  }
  0x89   :  { %70 = vst.msk [vmem:[#allocation0] sm:$0x1] %vm69_vm11, %v68_v26  }
  0x8a   :  { %76 = vst.msk [vmem:[#allocation0] sm:$0x1] %vm75_vm12, %v74_v27  }
  0x8c   :  { %v80_v28 = vpop.permute.xlu0 %79   ;;  %v86_v29 = vpop.permute.xlu1 %85  }
  0x8d   :  { %82 = vst.msk [vmem:[#allocation0] sm:$0x1] %vm81_vm13, %v80_v28  }
  0x8e   :  { %88 = vst.msk [vmem:[#allocation0] sm:$0x1] %vm87_vm14, %v86_v29  }
  0x90   :  { %v92_v30 = vpop.permute.xlu0 %91  }
  0x91   :  { %94 = vst.msk [vmem:[#allocation0] sm:$0x1] %vm93_vm15, %v92_v30  }
  0x98   :  { %v98_v31 = vld [vmem:[#allocation0] sm:$0x1] }
  0x99   :  { %100 = vst [vmem:[%s208_s1] sm:$0x1] %v98_v31 }

// kernel: conv3d_block_forward.4
= control target key start
LH: loop header
LB: loop body
LE: loop exit
PB: predicated region body
PF: predicated region fallthrough
CT: control target
= control target key end

     0   :  { %s1472_s27 = smov 0   ;;  %s1474_s28 = smov 0   ;;  %s1645_s0 = inlined_call_operand.vmem [shape: f32[2,16,16,64], index: 0, kind: input, shape index: {}]   ;;  %s1646_s1 = inlined_call_operand.vmem [shape: f32[2,16,16,64], index: 1, kind: input, shape index: {}]   ;;  %s1647_s2 = inlined_call_operand.vmem [shape: f32[1,64], index: 2, kind: input, shape index: {}]   ;;  %s1648_s3 = inlined_call_operand.vmem [shape: f32[1,64], index: 3, kind: input, shape index: {}]   ;;  %s1649_s4 = inlined_call_operand.vmem [shape: bf16[9,72,128], index: 4, kind: input, shape index: {}]   ;;  %s1650_s5 = inlined_call_operand.vmem [shape: f32[1,128], index: 5, kind: input, shape index: {}]   ;;  %s1651_s6 = inlined_call_operand.vmem [shape: f32[2,16,16,128], index: 6, kind: output, shape index: {0}]   ;;  %s1652_s7 = inlined_call_operand.vmem [shape: f32[2,16,1,128], index: 7, kind: output, shape index: {1}]   ;;  %s1653_s8 = inlined_call_operand.vmem [shape: f32[2,16,1,128], index: 8, kind: output, shape index: {2}]  }
   0x1   :  { %1658 = sst [smem:[#allocation10_spill]] %s1650_s5  ;;  %s1476_s29 = smov 0  }
   0x2   :  { %s1478_s30 = smov 0   ;;  %s1480_s9 = smov 0  }
   0x3   :  { %s1482_s10 = smov 0   ;;  %s1484_s11 = smov 0  }
   0x4 LB: > { %1659 = sst [smem:[#allocation3_spill]] %s1409_s30  ;;  %s31_s12 = sadd.s32 1, %s1409_s30  ;;  %s1421_s11 = sphi %s1484_s11, %s19_s11   ;;  %s1417_s10 = sphi %s1482_s10, %s1673_s10   ;;  %s1413_s9 = sphi %s1480_s9, %s1672_s9   ;;  %s1409_s30 = sphi %s1478_s30, %s1671_s30   ;;  %s1405_s29 = sphi %s1476_s29, %s1670_s29   ;;  %s1401_s28 = sphi %s1474_s28, %s1669_s28   ;;  %s1397_s27 = sphi %s1472_s27, %s1668_s27  }
   0x5   : > { %1660 = sst [smem:[#allocation4_spill]] %s1413_s9  ;;  %p32_p0 = scmp.ge.s32.totalorder %s31_s12, 3 }
   0x6   : > { %1661 = sst [smem:[#allocation5_spill]] %s1417_s10  ;;  %s34_s13 = sadd.s32 1, %s1413_s9 }
   0x7   : > { %1662 = sst [smem:[#allocation6_spill]] %s1421_s11  ;;  %p1142_p1 = scmp.ge.s32.totalorder %s1421_s11, 1 }
   0x8   : > { %p362_p2 = scmp.lt.s32.totalorder %s1421_s11, 97  ;;  %s1675_s12 = smov (%p32_p0, %s31_s12), 0 }
   0x9   : > { %1663 = sst [smem:[#allocation7_spill]] %s1675_s12  ;;  %s1677_s13 = smov (!%p32_p0, %s34_s13), %s1413_s9 }
   0xa   : > { %p363_p3 = pnand %p1142_p1, %p362_p2  ;;  %p36_p4 = scmp.ge.s32.totalorder %s1677_s13, 16 }
   0xb   : > { %s38_s14 = sadd.s32 1, %s1417_s10  ;;  %s439_s15 = sadd.s32 (!%p363_p3), %s1397_s27, %s1401_s28 }
   0xc   : > { %s1679_s13 = smov (%p36_p4, %s1677_s13), 0  ;;  %s1681_s14 = smov (!%p36_p4, %s38_s14), %s1417_s10 }
   0xd   : > { %1664 = sst [smem:[#allocation8_spill]] %s1679_s13  ;;  %p40_p5 = scmp.ge.s32.totalorder %s1681_s14, 2 }
   0xe   : > { %366 = sbr.rel (%p363_p3) target bundleno = 449 (0x1c1), region = 44  ;;  %p445_p6 = scmp.lt.s32.totalorder (!%p363_p3), %s1405_s29, 1 }
   0xf   : > { %s1683_s14 = smov (%p40_p5, %s1681_s14), 0  ;;  %s1520_s16 = sadd.s32 (!%p363_p3), 4294967295, %s439_s15 }
  0x10   : > { %1665 = sst [smem:[#allocation9_spill]] %s1683_s14  ;;  %p483_p7 = scmp.lt.s32.totalorder (!%p363_p3), %s1401_s28, 15 }
  0x11   : > { %p441_p8 = scmp.lt.s32.totalorder (!%p363_p3), %s1520_s16, 15  ;;  %p1144_p9 = scmp.gt.s32.totalorder (!%p363_p3), %s1520_s16, 0 }
  0x12   : > { %p1166_p11 = scmp.ne.s32.totalorder (!%p363_p3), %s1397_s27, 0 }
  0x15   : > { %s1685_s29 = smov (!%p445_p6, %s1405_s29), 1  ;;  %s1689_s28 = smov (!%p483_p7, %s1401_s28), 15 }
  0x16   : > { %s442_s17 = scalar_select %p441_p8, %s1520_s16, 15 }
  0x17   : > { %s1164_s18 = sshll.u32 %s1685_s29, 4  ;;  %s1150_s19 = sshll.u32 %s1685_s29, 5  ;;  %v1423_v0 = vmov (!%p1166_p11), 0.0  }
  0x18   : > { %s1687_s17 = smov (!%p1144_p9, %s442_s17), 0  ;;  %s1161_s20 = sshll.u32 %s1689_s28, 1  ;;  %509 = vst [vmem:[#allocation2] sm:$0xff] (!%p1166_p11), %v1423_v0  ;;  %510 = vst [vmem:[#allocation2 + $0x8] sm:$0xff] (!%p1166_p11), %v1423_v0 }
  0x19   : > { %p447_p10 = scmp.lt.s32.totalorder %s1687_s17, 15  ;;  %s1527_s21 = sadd.s32 %s1164_s18, %s1689_s28 }
  0x1a   : > { %s487_s22 = sadd.s32 %s1161_s20, %s1150_s19  ;;  %s496_s25 = scalar_lea.vmem %s1652_s7, %s1527_s21 }
  0x1b   : > { %s1691_s17 = smov (!%p447_p10, %s1687_s17), 15  ;;  %s1163_s15 = sshll.u32 %s487_s22, 3 }
  0x1c   : > { %s1149_s26 = sshll.u32 %s1691_s17, 1  ;;  %s1536_s10 = scalar_lea.vmem %s1651_s6, %s1163_s15 }
  0x1d   : > { %s451_s14 = sadd.s32 %s1150_s19, %s1149_s26  ;;  %s503_s18 = scalar_lea.vmem %s1653_s8, %s1527_s21 }
  0x1e   : > { %s1151_s29 = sshll.u32 %s451_s14, 3  ;;  %508 = sbr.rel (%p1166_p11) target bundleno = 37 (0x25), region = 48 }
  0x1f   : > { %s453_s20 = scalar_lea.vmem %s1645_s0, %s1151_s29  ;;  %s474_s17 = scalar_lea.vmem %s1646_s1, %s1151_s29 }
  0x25 PF: > { %p513_p12 = scmp.ge.s32.totalorder %s1520_s16, 0  ;;  %p514_p13 = scmp.le.s32.totalorder %s1520_s16, 15 }
  0x27   : > { %p515_p0 = pnand %p514_p13, %p513_p12 }
  0x28   : > { %v519_v1 = vld [vmem:[%s453_s20] sm:$0xff] (!%p515_p0)  ;;  %v520_v2 = vld [vmem:[%s453_s20 + $0x8] sm:$0xff] (!%p515_p0)  ;;  %s1226_s12 = smul.u32 (!%p515_p0), 108, %s1397_s27  ;;  %v1424_v7 = vmov (!%p515_p0), 0.0   ;;  %vm1425_vm0 = vmmov (!%p515_p0), 0   ;;  %vm547_vm1 = vcmask (!%p515_p0), 1040384  }
  0x29   : > { %518 = sbr.rel (%p515_p0) target bundleno = 422 (0x1a6), region = 52  ;;  %v1168_v3 = vld [vmem:[%s1647_s2] ss:$0 sm:$0xff] (!%p515_p0)  ;;  %1259 = vmatprep.subr.bf16.mxu1 (!%p515_p0), %v1424_v7  ;;  %1245 = vmatprep.subr.bf16.mxu0 (!%p515_p0), %v1424_v7  ;;  %v542_v11 = vld [vmem:[%s474_s17 + $0x8] sm:$0xff] (!%p515_p0)  ;;  %s1426_s19 = smov (!%p515_p0), 4   ;;  %vm646_vm2 = vcmask (!%p515_p0), 1043456  }
  0x2a   : > { %v528_v4 = vmul.f32 (!%p515_p0), %v1168_v3, %v519_v1  ;;  %v529_v5 = vmul.f32 (!%p515_p0), %v1168_v3, %v520_v2  ;;  %v1169_v6 = vld [vmem:[%s1648_s3] ss:$0 sm:$0xff] (!%p515_p0)  ;;  %s1563_s16 = scalar_lea.vmem (!%p515_p0), %s1649_s4, %s1226_s12  ;;  %1269 = vmatprep.mubr.msk.bf16.mxu1 (!%p515_p0), %vm1425_vm0, %v1424_v7  ;;  %1255 = vmatprep.mubr.msk.bf16.mxu0 (!%p515_p0), %vm1425_vm0, %v1424_v7  ;;  %vm566_vm3 = vcmask (!%p515_p0), 31744   ;;  %vm570_vm4 = vcmask (!%p515_p0), 556032  }
  0x2b   : > { %v541_v10 = vld [vmem:[%s474_s17] sm:$0xff] (!%p515_p0)  ;;  %v1353_v15 = vld [vmem:[%s1563_s16 + $0x8] sm:$0xff] (!%p515_p0)   ;;  %v1355_v21 = vld [vmem:[%s1563_s16 + $0x10] sm:$0xff] (!%p515_p0)   ;;  %vm642_vm5 = vcmask (!%p515_p0), 588800   ;;  %vm602_vm6 = vsmask.f32 (!%p515_p0), 7424 }
  0x2c   : > { %v537_v8 = vadd.f32 (!%p515_p0), %v1169_v6, %v528_v4  ;;  %v538_v9 = vadd.f32 (!%p515_p0), %v1169_v6, %v529_v5  ;;  %v1352_v12 = vld [vmem:[%s1563_s16] sm:$0xff] (!%p515_p0)   ;;  %v1356_v22 = vld [vmem:[%s1563_s16 + $0x2c] sm:$0xff] (!%p515_p0)   ;;  %v1358_v26 = vld [vmem:[%s1563_s16 + $0x34] sm:$0xff] (!%p515_p0)   ;;  %vm779_vm7 = vcmask (!%p515_p0), 1046528  }
  0x2d   : > { %1260 = vmatpush3.bf16.msra.mxu1 (!%p515_p0), %v1352_v12  ;;  %v1354_v18 = vld [vmem:[%s1563_s16 + $0x24] sm:$0xff] (!%p515_p0)   ;;  %v1357_v28 = vld [vmem:[%s1563_s16 + $0x18] sm:$0xff] (!%p515_p0)   ;;  %v1359_v29 = vld [vmem:[%s1563_s16 + $0x20] ss:$0 sps:$4 sm:$0xff] (!%p515_p0)  }
  0x2e   : > { %v539_v13 = vmax.f32 (!%p515_p0), %v537_v8, 0.0  ;;  %v540_v14 = vmax.f32 (!%p515_p0), %v538_v9, 0.0  ;;  %1261 = vmatprep.subr.bf16.mxu1 (!%p515_p0), %v1424_v7  ;;  %1246 = vmatpush3.bf16.msra.mxu0 (!%p515_p0), %v1354_v18  ;;  %v1360_v30 = vld [vmem:[%s1563_s16 + $0x3c] sm:$0xff] (!%p515_p0)   ;;  %v1361_v31 = vld [vmem:[%s1563_s16 + $0x44] ss:$0 sps:$4 sm:$0xff] (!%p515_p0)   ;;  %v721_v32 = vsel (!%p515_p0), %vm646_vm2, %v1359_v29, 0 }
  0x2f   : > { %1247 = vmatprep.subr.bf16.mxu0 (!%p515_p0), %v1424_v7  ;;  %v648_v33 = vsel (!%p515_p0), %vm646_vm2, %v1361_v31, 0  ;;  %v1366_v34 = vld [vmem:[%s1563_s16 + $0x68] ss:$0 sps:$4 sm:$0xff] (!%p515_p0)   ;;  %v1363_v56 = vld [vmem:[%s1563_s16 + $0x50] sm:$0xff] (!%p515_p0)   ;;  %v1364_v57 = vld [vmem:[%s1563_s16 + $0x58] sm:$0xff] (!%p515_p0)  }
  0x30   : > { %v543_v16 = vadd.f32 %v541_v10, %v539_v13  ;;  %v544_v17 = vadd.f32 %v542_v11, %v540_v14  ;;  %v814_v35 = vsel %vm646_vm2, %v1366_v34, 0  ;;  %v1362_v54 = vld [vmem:[%s1563_s16 + $0x48] sm:$0xff]   ;;  %v1365_v58 = vld [vmem:[%s1563_s16 + $0x60] sm:$0xff]  }
  0x31   : > { %1262 = vmatpush3.bf16.msra.mxu1 %v1353_v15  ;;  %v859_v10 = vld [vmem:[#allocation2] sm:$0xff]  ;;  %v860_v13 = vld [vmem:[#allocation2 + $0x8] sm:$0xff] }
  0x32   : > { %v548_v19 = vrot.slane %v543_v16, 7  ;;  %v549_v20 = vrot.slane %v544_v17, 7  ;;  %1263 = vmatprep.subr.bf16.mxu1 %v1424_v7  ;;  %1248 = vmatpush3.bf16.msra.mxu0 %v1356_v22 }
  0x33   : > { %1249 = vmatprep.subr.bf16.mxu0 %v1424_v7 }
  0x34   : > { %v550_v23 = vsel %vm547_vm1, %v548_v19, %v549_v20  ;;  %v553_v24 = vsel %vm547_vm1, 0.0, %v548_v19  ;;  %v554_v27 = vsel %vm547_vm1, %v549_v20, 0.0 }
  0x35   : > { %v1347_v25 = vpack.i.bf16 %v550_v23, %v553_v24  ;;  %1264 = vmatpush3.bf16.msra.mxu1 %v1355_v21 }
  0x36   : > { %1265 = vmatprep.subr.bf16.mxu1 %v1424_v7  ;;  %1250 = vmatpush3.bf16.msra.mxu0 %v1358_v26 }
  0x37   : > { %1348 = vrot.lane.b32.xlu0 %v1347_v25, %s1426_s19  ;;  %1251 = vmatprep.subr.bf16.mxu0 %v1424_v7 }
  0x39   : > { %1266 = vmatpush3.bf16.msra.mxu1 %v1357_v28 }
  0x3a   : > { %1267 = vmatprep.subr.bf16.mxu1 %v1424_v7  ;;  %1252 = vmatpush3.bf16.msra.mxu0 %v1360_v30 }
  0x3b   : > { %561 = vrot.lane.b32.xlu0 %v554_v27, %s1426_s19  ;;  %1253 = vmatprep.subr.bf16.mxu0 %v1424_v7 }
  0x3d   : > { %1268 = vmatpush3.bf16.msra.mxu1 %v721_v32 }
  0x3e   : > { %1254 = vmatpush3.bf16.msra.mxu0 %v648_v33 }
  0x3f   : > { %1273 = vmatprep.subr.bf16.mxu0 %v1424_v7 }
  0xa9   : > { %v1349_v36 = vpop.permute.xlu0 %1348 }
  0xaa   : > { %v1351_v37 = vunpack.i.h.bf16 %v1349_v36  ;;  %v1350_v38 = vunpack.i.l.bf16 %v1349_v36 }
  0xac   : > { %v567_v39 = vsel %vm566_vm3, 0.0, %v1350_v38  ;;  %v568_v40 = vsel %vm566_vm3, 0.0, %v1351_v37 }
  0xad   : > { %v562_v41 = vpop.permute.xlu0 %561  ;;  %v571_v42 = vsel %vm570_vm4, %v567_v39, 0.0  ;;  %v572_v43 = vsel %vm570_vm4, %v568_v40, 0.0 }
  0xae   : > { %v569_v44 = vsel %vm566_vm3, 0.0, %v562_v41  ;;  %v574_v45 = vpack.c.bf16 %v572_v43, %v571_v42 }
  0xaf   : > { %v573_v46 = vsel %vm570_vm4, %v569_v44, 0.0 }
  0xb0   : > { %v588_v47 = vpack.c.bf16 %v573_v46, %v573_v46  ;;  %1270 = vmatmul.mubr.msk.bf16.vlgmr.msra.gmra.mrb[0].mxu1 %vm642_vm5, %v574_v45  ;;  %v606_v48 = vshll.u32 %v574_v45, 16  ;;  %v604_v50 = vshrl.u32 %v574_v45, 16  ;;  %v780_v60 = vrot.slane %v574_v45, 1 }
  0xb2   : > { %v611_v49 = vshll.u32 %v588_v47, 16  ;;  %v608_v51 = vrot.slane %v606_v48, 1  ;;  %v781_v59 = vrot.slane %v588_v47, 1 }
  0xb4   : > { %v613_v52 = vrot.slane %v611_v49, 1  ;;  %v609_v53 = vor.u32 %v608_v51, %v604_v50  ;;  %v782_v61 = vsel %vm779_vm7, %v780_v60, %v781_v59 }
  0xb6   : > { %v614_v55 = vsel %vm602_vm6, %v609_v53, %v613_v52 }
  0xb7   : > { %1256 = vmatmul.mubr.msk.bf16.vlgmr.msra.gmra.mrb[0].mxu0 %vm642_vm5, %v614_v55 }
  0xb8   : > { %1274 = vmatpush3.bf16.msra.mxu0 %v1362_v54  ;;  %1283 = vmatprep.mubr.msk.bf16.mxu0 %vm1425_vm0, %v1424_v7 }
  0xb9   : > { %1275 = vmatprep.subr.bf16.mxu0 %v1424_v7 }
  0xbc   : > { %1276 = vmatpush3.bf16.msra.mxu0 %v1363_v56 }
  0xbd   : > { %1277 = vmatprep.subr.bf16.mxu0 %v1424_v7 }
  0xc0   : > { %1278 = vmatpush3.bf16.msra.mxu0 %v1364_v57 }
  0xc1   : > { %1279 = vmatprep.subr.bf16.mxu0 %v1424_v7 }
  0xc4   : > { %1280 = vmatpush3.bf16.msra.mxu0 %v1365_v58 }
  0xc5   : > { %1281 = vmatprep.subr.bf16.mxu0 %v1424_v7 }
  0xc8   : > { %1282 = vmatpush3.bf16.msra.mxu0 %v814_v35 }
  0xcb   : > { %1284 = vmatmul.mubr.msk.bf16.vlgmr.msra.gmra.mrb[4].mxu0 %vm642_vm5, %v782_v61 }
 0x183   : > { %v757_v62 = vpop.f32.mrb[0].mxu1 }
 0x184   : > { %v1271_v63 = vpop.f32.mrb[1].mxu1 }
 0x185   : > { %v760_v0 = vpop.f32.mrb[2].mxu1 }
 0x186   : > { %v1272_v1 = vpop.f32.mrb[3].mxu1 }
 0x18a   : > { %v684_v2 = vpop.f32.mrb[0].mxu0 }
 0x18b   : > { %v758_v3 = vadd.f32 %v757_v62, %v684_v2  ;;  %v1257_v4 = vpop.f32.mrb[1].mxu0 }
 0x18c   : > { %v687_v5 = vpop.f32.mrb[2].mxu0 }
 0x18d   : > { %v761_v6 = vadd.f32 %v760_v0, %v687_v5  ;;  %v1258_v8 = vpop.f32.mrb[3].mxu0 }
 0x19e   : > { %v850_v9 = vpop.f32.mrb[4].mxu0 }
 0x19f   : > { %v857_v7 = vadd.f32 %v850_v9, %v758_v3  ;;  %v1285_v11 = vpop.f32.mrb[5].mxu0 }
 0x1a0   : > { %v853_v12 = vpop.f32.mrb[6].mxu0 }
 0x1a1   : > { %v861_v14 = vadd.f32 %v859_v10, %v857_v7  ;;  %v858_v15 = vadd.f32 %v853_v12, %v761_v6  ;;  %v1286_v16 = vpop.f32.mrb[7].mxu0 }
 0x1a3   : > { %863 = vst [vmem:[#allocation2] sm:$0xff] %v861_v14  ;;  %v862_v17 = vadd.f32 %v860_v13, %v858_v15 }
 0x1a5   : > { %864 = vst [vmem:[#allocation2 + $0x8] sm:$0xff] %v862_v17 }
 0x1a6 PF: > { %p1210_p1 = scmp.ne.s32.totalorder %s1397_s27, 2 }
 0x1a7   : > { %s1666_s26 = sld [smem:[#allocation10_spill]] (!%p1210_p1) }
 0x1a8   : > { %868 = sbr.rel (%p1210_p1) target bundleno = 449 (0x1c1), region = 56 }
 0x1aa   : > { %v869_v18 = vld [vmem:[#allocation2] sm:$0xff] (!%p1210_p1) }
 0x1ac   : > { %v870_v20 = vld [vmem:[#allocation2 + $0x8] sm:$0xff] (!%p1210_p1) }
 0x1ad   : > { %v1211_v19 = vld [vmem:[%s1666_s26] ss:$0 sm:$0xff] (!%p1210_p1) }
 0x1ae   : > { %v878_v21 = vadd.f32 (!%p1210_p1), %v1211_v19, %v869_v18  ;;  %v879_v22 = vadd.f32 (!%p1210_p1), %v1211_v19, %v870_v20 }
 0x1b0   : > { %880 = vst [vmem:[%s1536_s10] sm:$0xff] %v878_v21  ;;  %881 = vst [vmem:[%s1536_s10 + $0x8] sm:$0xff] %v879_v22  ;;  %v882_v23 = vadd.f32 %v879_v22, %v878_v21  ;;  %v890_v24 = vmul.f32 %v878_v21, %v878_v21  ;;  %v891_v25 = vmul.f32 %v879_v22, %v879_v22 }
 0x1b2   : > { %v883_v26 = vrot.slane %v882_v23, 4  ;;  %v892_v27 = vadd.f32 %v891_v25, %v890_v24 }
 0x1b4   : > { %v884_v28 = vadd.f32 %v883_v26, %v882_v23  ;;  %v893_v29 = vrot.slane %v892_v27, 4 }
 0x1b6   : > { %v885_v30 = vrot.slane %v884_v28, 2  ;;  %v894_v31 = vadd.f32 %v893_v29, %v892_v27 }
 0x1b8   : > { %v886_v32 = vadd.f32 %v885_v30, %v884_v28  ;;  %v895_v33 = vrot.slane %v894_v31, 2 }
 0x1ba   : > { %v887_v34 = vrot.slane %v886_v32, 1  ;;  %v896_v35 = vadd.f32 %v895_v33, %v894_v31 }
 0x1bc   : > { %v888_v36 = vadd.f32 %v887_v34, %v886_v32  ;;  %v897_v37 = vrot.slane %v896_v35, 1 }
 0x1be   : > { %889 = vst [vmem:[%s496_s25] sm:$0x1] %v888_v36  ;;  %v898_v38 = vadd.f32 %v897_v37, %v896_v35 }
 0x1c0   : > { %899 = vst [vmem:[%s503_s18] sm:$0x1] %v898_v38 }
 0x1c1 PF: > { %s1667_s28 = sld [smem:[#allocation6_spill]]  ;;  %s1668_s27 = sld [smem:[#allocation3_spill]] }
 0x1c2   : > { %s1670_s29 = sld [smem:[#allocation5_spill]]  ;;  %s1671_s30 = sld [smem:[#allocation7_spill]] }
 0x1c3   : > { %s1672_s9 = sld [smem:[#allocation8_spill]]  ;;  %s1673_s10 = sld [smem:[#allocation9_spill]] }
 0x1c7   : > { %s19_s11 = sadd.s32 1, %s1667_s28   ;;  %s1669_s28 = sld [smem:[#allocation4_spill]] }
 0x1c8   : > { %p16_p2 = scmp.ge.s32.totalorder %s19_s11, 98  }
 0x1ca   :  { %18 = sbr.rel (!%p16_p2) target bundleno = 4 (0x4), region = 116 }

// kernel: conv3d_block_forward.5
= control target key start
LH: loop header
LB: loop body
LE: loop exit
PB: predicated region body
PF: predicated region fallthrough
CT: control target
= control target key end

     0   :  { %s1604_s12 = smov 0   ;;  %s1606_s13 = smov 0   ;;  %s2231_s0 = inlined_call_operand.vmem [shape: f32[2,16,16,128], index: 0, kind: input, shape index: {}]   ;;  %s2232_s1 = inlined_call_operand.vmem [shape: f32[1,128], index: 1, kind: input, shape index: {}]   ;;  %s2233_s2 = inlined_call_operand.vmem [shape: f32[1,128], index: 2, kind: input, shape index: {}]   ;;  %s2234_s3 = inlined_call_operand.vmem [shape: f32[2,8,8,64], index: 3, kind: output, shape index: {}]  }
   0x1   :  { %s1608_s14 = smov 0   ;;  %s1610_s15 = smov 0  }
   0x2   :  { %s1612_s16 = smov 0  }
   0x3 LB: > { %s22_s17 = sadd.s32 1, %s1559_s14  ;;  %s25_s18 = sadd.s32 1, %s1563_s15  ;;  %s1567_s16 = sphi %s1612_s16, %s13_s16   ;;  %s1563_s15 = sphi %s1610_s15, %s2238_s15   ;;  %s1559_s14 = sphi %s1608_s14, %s2237_s14   ;;  %s1555_s13 = sphi %s1606_s13, %s2236_s13   ;;  %s1551_s12 = sphi %s1604_s12, %s2235_s12  }
   0x4   : > { %p23_p0 = scmp.ge.s32.totalorder %s22_s17, 8  ;;  %p1447_p1 = scmp.ge.s32.totalorder %s1567_s16, 1 }
   0x5   : > { %p159_p2 = scmp.lt.s32.totalorder %s1567_s16, 17 }
   0x6   : > { %s2240_s17 = smov (%p23_p0, %s22_s17), 0  ;;  %s2242_s18 = smov (!%p23_p0, %s25_s18), %s1563_s15 }
   0x7   : > { %p160_p3 = pnand %p1447_p1, %p159_p2  ;;  %p27_p4 = scmp.ge.s32.totalorder %s2242_s18, 2 }
   0x8   : > { %s1448_s19 = sshll.u32 (!%p160_p3), %s1551_s12, 1  ;;  %p192_p5 = scmp.lt.s32.totalorder (!%p160_p3), %s1555_s13, 1  ;;  %v248_v0 = vlaneseq (!%p160_p3)  ;;  %v1569_v1 = vmov (!%p160_p3), 1983009808   ;;  %v1454_v3 = vld [vmem:[%s2232_s1] ss:$0 sm:$0xff] (!%p160_p3) }
   0x9   : > { %s2244_s18 = smov (%p27_p4, %s2242_s18), 0  ;;  %163 = sbr.rel (%p160_p3) target bundleno = 522 (0x20a), region = 32 }
   0xa   : > { %p194_p6 = scmp.lt.s32.totalorder (!%p160_p3), %s1448_s19, 15  ;;  %v246_v2 = vunpack.c.l.s4 (!%p160_p3), %v1569_v1  ;;  %v1455_v4 = vld [vmem:[%s2233_s2] ss:$0 sm:$0xff] (!%p160_p3)  ;;  %v1649_v7 = vshrl.u32 (!%p160_p3), %v248_v0, 7  ;;  %s1570_s4 = smov (!%p160_p3), 112   ;;  %vm443_vm0 = vcmask (!%p160_p3), 1041409  }
   0xb   : > { %s1571_s5 = smov (!%p160_p3), 96   ;;  %s1572_s6 = smov (!%p160_p3), 80   ;;  %vm445_vm1 = vcmask (!%p160_p3), 1043459   ;;  %vm447_vm2 = vcmask (!%p160_p3), 1045509   ;;  %v1577_v63 = vmov (!%p160_p3), 1934713408  }
   0xc   : > { %v247_v11 = vunpack.c.0.s8 (!%p160_p3), %v246_v2  ;;  %s1573_s7 = smov (!%p160_p3), 64   ;;  %s1574_s8 = smov (!%p160_p3), 48   ;;  %v702_v0 = vunpack.c.l.s4 (!%p160_p3), %v1577_v63  ;;  %vm449_vm3 = vcmask (!%p160_p3), 1047559   ;;  %vm1338_vm4 = vcmask (!%p160_p3), 64512  }
   0xd   : > { %s1575_s9 = smov (!%p160_p3), 32   ;;  %s1576_s10 = smov (!%p160_p3), 16   ;;  %vm1340_vm5 = vcmask (!%p160_p3), 130048   ;;  %vm1342_vm6 = vcmask (!%p160_p3), 195584   ;;  %vm1344_vm7 = vcmask (!%p160_p3), 261120   ;;  %vm1346_vm8 = vcmask (!%p160_p3), 326656  }
   0xe   : > { %v1652_v21 = vsub.s32 (!%p160_p3), %v247_v11, %v1649_v7  ;;  %s1578_s11 = smov (!%p160_p3), 120   ;;  %p204_p7 = scmp.lt.s32.totalorder (!%p160_p3), %s1551_s12, 7  ;;  %vm1348_vm9 = vcmask (!%p160_p3), 392192   ;;  %vm1350_vm10 = vcmask (!%p160_p3), 457728   ;;  %vm1352_vm11 = vcmask (!%p160_p3), 523264  }
  0x10   : > { %s2246_s13 = smov (!%p192_p5, %s1555_s13), 1  ;;  %s2248_s19 = smov (!%p194_p6, %s1448_s19), 15 }
  0x11   : > { %s1450_s20 = sshll.u32 %s2246_s13, 5  ;;  %s1449_s21 = sshll.u32 %s2248_s19, 1 }
  0x12   : > { %s198_s22 = sadd.s32 %s1450_s20, %s1449_s21  ;;  %s1580_s19 = smov 8  }
  0x13   : > { %s1451_s23 = sshll.u32 %s198_s22, 3  ;;  %s1581_s20 = smov 24  }
  0x14   : > { %s200_s28 = scalar_lea.vmem %s2231_s0, %s1451_s23  ;;  %s1582_s21 = smov 40  }
  0x15   : > { %v210_v5 = vld [vmem:[%s200_s28] sm:$0xff]  ;;  %v212_v6 = vld [vmem:[%s200_s28 + $0x10] sm:$0xff]  ;;  %v211_v8 = vld [vmem:[%s200_s28 + $0x8] sm:$0xff]  ;;  %s1583_s22 = smov 56   ;;  %s2250_s12 = smov (!%p204_p7, %s1551_s12), 7 }
  0x16   : > { %v221_v9 = vmul.f32 %v1454_v3, %v210_v5  ;;  %v223_v10 = vmul.f32 %v1454_v3, %v212_v6  ;;  %v213_v12 = vld [vmem:[%s200_s28 + $0x18] sm:$0xff]  ;;  %v222_v13 = vmul.f32 %v1454_v3, %v211_v8  ;;  %s1452_s23 = sshll.u32 %s2246_s13, 3 }
  0x17   : > { %v224_v14 = vmul.f32 %v1454_v3, %v213_v12  ;;  %s207_s24 = sadd.s32 %s1452_s23, %s2250_s12 }
  0x18   : > { %v232_v15 = vadd.f32 %v1455_v4, %v221_v9  ;;  %v234_v16 = vadd.f32 %v1455_v4, %v223_v10  ;;  %v233_v17 = vadd.f32 %v1455_v4, %v222_v13  ;;  %v703_v9 = vunpack.c.0.s8 %v702_v0  ;;  %s1453_s25 = sshll.u32 %s207_s24, 3 }
  0x19   : > { %v235_v18 = vadd.f32 %v1455_v4, %v224_v14  ;;  %s209_s27 = scalar_lea.vmem %s2234_s3, %s1453_s25 }
  0x1a   : > { %v236_v19 = vmax.f32 %v232_v15, 0.0  ;;  %v238_v20 = vmax.f32 %v234_v16, 0.0  ;;  %v237_v22 = vmax.f32 %v233_v17, 0.0 }
  0x1b   : > { %v239_v23 = vmax.f32 %v235_v18, 0.0 }
  0x1c   : > { %v240_v24 = vmax.f32 %v236_v19, %v238_v20  ;;  %v1785_v19 = vsub.s32 %v703_v9, %v1649_v7  ;;  %v1579_v7 = vmov 0.0  }
  0x1d   : > { %v241_v25 = vmax.f32 %v237_v22, %v239_v23 }
  0x1e   : > { %v251_v26 = vrot.slane %v240_v24, %v1652_v21  ;;  %v244_v27 = vcombine.high %v240_v24, %v240_v24 }
  0x1f   : > { %v268_v28 = vrot.slane %v241_v25, %v1652_v21  ;;  %v261_v29 = vcombine.high %v241_v25, %v241_v25 }
  0x20   : > { %v1456_v30 = vrot.slane %v251_v26, 9  ;;  %v258_v31 = vrot.slane %v244_v27, %v1652_v21  ;;  %v259_v32 = vcombine.high %v251_v26, %v251_v26 }
  0x21   : > { %v276_v33 = vcombine.high %v268_v28, %v268_v28  ;;  %v1460_v34 = vrot.slane %v268_v28, 9  ;;  %v275_v38 = vrot.slane %v261_v29, %v1652_v21 }
  0x22   : > { %v1657_v35 = vmax.f32 %v251_v26, %v1456_v30  ;;  %v1458_v37 = vrot.slane %v258_v31, 9  ;;  %v1457_v40 = vrot.slane %v259_v32, 9  ;;  %v260_v48 = vcombine.high %v258_v31, %v258_v31 }
  0x23   : > { %v1461_v36 = vrot.slane %v276_v33, 9  ;;  %v1662_v39 = vmax.f32 %v268_v28, %v1460_v34  ;;  %v1462_v43 = vrot.slane %v275_v38, 9  ;;  %v277_v44 = vcombine.high %v275_v38, %v275_v38 }
  0x24   : > { %326 = vrot.lane.b32.xlu0 %v1657_v35, %s1570_s4  ;;  %v1668_v42 = vmax.f32 %v258_v31, %v1458_v37  ;;  %v1672_v45 = vmax.f32 %v259_v32, %v1457_v40  ;;  %v1459_v50 = vrot.slane %v260_v48, 9 }
  0x25   : > { %v1664_v41 = vmax.f32 %v276_v33, %v1461_v36  ;;  %v1676_v46 = vmax.f32 %v275_v38, %v1462_v43  ;;  %v1463_v47 = vrot.slane %v277_v44, 9 }
  0x26   : > { %v1687_v51 = vmax.f32 %v260_v48, %v1459_v50  ;;  %v442_v52 = vrot.slane %v1672_v45, 7 }
  0x27   : > { %336 = vrot.lane.b32.xlu1 %v1664_v41, %s1570_s4  ;;  %v1682_v49 = vmax.f32 %v277_v44, %v1463_v47  ;;  %v460_v53 = vrot.slane %v1664_v41, 7 }
  0x28   : > { %334 = vrot.lane.b32.xlu0 %v1662_v39, %s1570_s4  ;;  %v444_v56 = vsel %vm443_vm0, %v442_v52, %v1657_v35 }
  0x29   : > { %v461_v57 = vsel %vm443_vm0, %v460_v53, %v1662_v39  ;;  %v446_v61 = vsel %vm445_vm1, %v442_v52, %v444_v56 }
  0x2a   : > { %v462_v62 = vsel %vm445_vm1, %v460_v53, %v461_v57  ;;  %v448_v6 = vsel %vm447_vm2, %v442_v52, %v446_v61 }
  0x2b   : > { %330 = vrot.lane.b32.xlu1 %v1668_v42, %s1570_s4  ;;  %v463_v8 = vsel %vm447_vm2, %v460_v53, %v462_v62  ;;  %v450_v14 = vsel %vm449_vm3, %v442_v52, %v448_v6 }
  0x2c   : > { %328 = vrot.lane.b32.xlu0 %v1672_v45, %s1570_s4  ;;  %v464_v15 = vsel %vm449_vm3, %v460_v53, %v463_v8 }
  0x2f   : > { %338 = vrot.lane.b32.xlu1 %v1676_v46, %s1570_s4 }
  0x30   : > { %344 = vrot.lane.b32.xlu0 %v1672_v45, %s1571_s5 }
  0x33   : > { %340 = vrot.lane.b32.xlu1 %v1682_v49, %s1570_s4 }
  0x34   : > { %352 = vrot.lane.b32.xlu0 %v1664_v41, %s1571_s5 }
  0x37   : > { %348 = vrot.lane.b32.xlu1 %v1687_v51, %s1571_s5 }
  0x38   : > { %360 = vrot.lane.b32.xlu0 %v1672_v45, %s1572_s6 }
  0x3b   : > { %356 = vrot.lane.b32.xlu1 %v1682_v49, %s1571_s5 }
  0x3c   : > { %368 = vrot.lane.b32.xlu0 %v1664_v41, %s1572_s6 }
  0x3f   : > { %364 = vrot.lane.b32.xlu1 %v1687_v51, %s1572_s6 }
  0x40   : > { %332 = vrot.lane.b32.xlu0 %v1687_v51, %s1570_s4 }
  0x43   : > { %372 = vrot.lane.b32.xlu1 %v1682_v49, %s1572_s6 }
  0x44   : > { %342 = vrot.lane.b32.xlu0 %v1657_v35, %s1571_s5 }
  0x47   : > { %346 = vrot.lane.b32.xlu1 %v1668_v42, %s1571_s5 }
  0x48   : > { %350 = vrot.lane.b32.xlu0 %v1662_v39, %s1571_s5 }
  0x4b   : > { %354 = vrot.lane.b32.xlu1 %v1676_v46, %s1571_s5 }
  0x4c   : > { %358 = vrot.lane.b32.xlu0 %v1657_v35, %s1572_s6 }
  0x4f   : > { %362 = vrot.lane.b32.xlu1 %v1668_v42, %s1572_s6 }
  0x50   : > { %366 = vrot.lane.b32.xlu0 %v1662_v39, %s1572_s6 }
  0x53   : > { %370 = vrot.lane.b32.xlu1 %v1676_v46, %s1572_s6 }
  0x54   : > { %376 = vrot.lane.b32.xlu0 %v1672_v45, %s1573_s7 }
  0x57   : > { %380 = vrot.lane.b32.xlu1 %v1687_v51, %s1573_s7 }
  0x58   : > { %384 = vrot.lane.b32.xlu0 %v1664_v41, %s1573_s7 }
  0x5b   : > { %388 = vrot.lane.b32.xlu1 %v1682_v49, %s1573_s7 }
  0x5c   : > { %392 = vrot.lane.b32.xlu0 %v1672_v45, %s1574_s8 }
  0x5f   : > { %396 = vrot.lane.b32.xlu1 %v1687_v51, %s1574_s8 }
  0x60   : > { %400 = vrot.lane.b32.xlu0 %v1664_v41, %s1574_s8 }
  0x63   : > { %404 = vrot.lane.b32.xlu1 %v1682_v49, %s1574_s8 }
  0x64   : > { %374 = vrot.lane.b32.xlu0 %v1657_v35, %s1573_s7 }
  0x67   : > { %378 = vrot.lane.b32.xlu1 %v1668_v42, %s1573_s7 }
  0x68   : > { %382 = vrot.lane.b32.xlu0 %v1662_v39, %s1573_s7 }
  0x6b   : > { %386 = vrot.lane.b32.xlu1 %v1676_v46, %s1573_s7 }
  0x6c   : > { %390 = vrot.lane.b32.xlu0 %v1657_v35, %s1574_s8 }
  0x6f   : > { %394 = vrot.lane.b32.xlu1 %v1668_v42, %s1574_s8 }
  0x70   : > { %398 = vrot.lane.b32.xlu0 %v1662_v39, %s1574_s8 }
  0x73   : > { %402 = vrot.lane.b32.xlu1 %v1676_v46, %s1574_s8 }
  0x74   : > { %408 = vrot.lane.b32.xlu0 %v1672_v45, %s1575_s9 }
  0x77   : > { %412 = vrot.lane.b32.xlu1 %v1687_v51, %s1575_s9 }
  0x78   : > { %416 = vrot.lane.b32.xlu0 %v1664_v41, %s1575_s9 }
  0x7b   : > { %420 = vrot.lane.b32.xlu1 %v1682_v49, %s1575_s9 }
  0x7c   : > { %424 = vrot.lane.b32.xlu0 %v1672_v45, %s1576_s10 }
  0x7f   : > { %428 = vrot.lane.b32.xlu1 %v1687_v51, %s1576_s10 }
  0x80   : > { %432 = vrot.lane.b32.xlu0 %v1664_v41, %s1576_s10 }
  0x83   : > { %436 = vrot.lane.b32.xlu1 %v1682_v49, %s1576_s10 }
  0x84   : > { %406 = vrot.lane.b32.xlu0 %v1657_v35, %s1575_s9 }
  0x87   : > { %410 = vrot.lane.b32.xlu1 %v1668_v42, %s1575_s9 }
  0x88   : > { %414 = vrot.lane.b32.xlu0 %v1662_v39, %s1575_s9 }
  0x8b   : > { %418 = vrot.lane.b32.xlu1 %v1676_v46, %s1575_s9 }
  0x8c   : > { %422 = vrot.lane.b32.xlu0 %v1657_v35, %s1576_s10 }
  0x8f   : > { %426 = vrot.lane.b32.xlu1 %v1668_v42, %s1576_s10 }
  0x90   : > { %430 = vrot.lane.b32.xlu0 %v1662_v39, %s1576_s10 }
  0x93   : > { %434 = vrot.lane.b32.xlu1 %v1676_v46, %s1576_s10 }
  0x96   : > { %v327_v54 = vpop.permute.xlu0 %326 }
  0x99   : > { %v337_v55 = vpop.permute.xlu1 %336 }
  0x9a   : > { %v488_v58 = vrot.slane %v337_v55, 7  ;;  %v335_v59 = vpop.permute.xlu0 %334 }
  0x9c   : > { %v489_v60 = vsel %vm443_vm0, %v488_v58, %v335_v59 }
  0x9d   : > { %v490_v1 = vsel %vm445_vm1, %v488_v58, %v489_v60  ;;  %v1772_v2 = vpop.permute.xlu1 %330 }
  0x9e   : > { %v329_v3 = vpop.permute.xlu0 %328  ;;  %v491_v4 = vsel %vm447_vm2, %v488_v58, %v490_v1 }
  0x9f   : > { %v474_v5 = vrot.slane %v329_v3, 7  ;;  %v492_v16 = vsel %vm449_vm3, %v488_v58, %v491_v4 }
  0xa0   : > { %v772_v23 = vcombine.low %v464_v15, %v492_v16 }
  0xa1   : > { %v475_v10 = vsel %vm443_vm0, %v474_v5, %v327_v54  ;;  %v339_v11 = vpop.permute.xlu1 %338 }
  0xa2   : > { %v476_v12 = vsel %vm445_vm1, %v474_v5, %v475_v10  ;;  %v345_v13 = vpop.permute.xlu0 %344  ;;  %v1801_v31 = vrot.slane %v772_v23, %v1785_v19 }
  0xa3   : > { %v477_v17 = vsel %vm447_vm2, %v474_v5, %v476_v12  ;;  %v502_v43 = vrot.slane %v345_v13, 7 }
  0xa4   : > { %v478_v18 = vsel %vm449_vm3, %v474_v5, %v477_v17  ;;  %v1815_v36 = vcombine.high %v1801_v31, %v1579_v7 }
  0xa5   : > { %v341_v20 = vpop.permute.xlu1 %340  ;;  %v700_v22 = vcombine.low %v450_v14, %v478_v18 }
  0xa6   : > { %v495_v24 = vrot.slane %v341_v20, 7  ;;  %v353_v25 = vpop.permute.xlu0 %352 }
  0xa7   : > { %v1788_v26 = vrot.slane %v700_v22, %v1785_v19  ;;  %v516_v48 = vrot.slane %v353_v25, 7 }
  0xa8   : > { %v496_v27 = vsel %vm443_vm0, %v495_v24, %v339_v11 }
  0xa9   : > { %v497_v28 = vsel %vm445_vm1, %v495_v24, %v496_v27  ;;  %v1792_v29 = vpop.permute.xlu1 %348  ;;  %876 = vrot.lane.b32.xlu0 %v1788_v26, %s1578_s11  ;;  %v1798_v30 = vcombine.high %v1788_v26, %v1579_v7  ;;  %v453_v27 = vrot.slane %v1687_v51, 7 }
  0xaa   : > { %v498_v32 = vsel %vm447_vm2, %v495_v24, %v497_v28  ;;  %v361_v33 = vpop.permute.xlu0 %360 }
  0xab   : > { %884 = vrot.lane.b32.xlu1 %v1798_v30, %s1578_s11  ;;  %v1807_v34 = vsel %vm449_vm3, %v495_v24, %v498_v32  ;;  %v530_v52 = vrot.slane %v361_v33, 7 }
  0xad   : > { %v1809_v35 = vpop.permute.xlu1 %356  ;;  %908 = vrot.lane.b32.xlu0 %v1801_v31, %s1578_s11 }
  0xae   : > { %v369_v37 = vpop.permute.xlu0 %368 }
  0xaf   : > { %916 = vrot.lane.b32.xlu1 %v1815_v36, %s1578_s11  ;;  %v544_v60 = vrot.slane %v369_v37, 7  ;;  %v467_v37 = vrot.slane %v1682_v49, 7 }
  0xb1   : > { %v1819_v38 = vpop.permute.xlu1 %364  ;;  %v468_v51 = vsel %vm443_vm0, %v467_v37, %v1676_v46 }
  0xb2   : > { %v333_v39 = vpop.permute.xlu0 %332 }
  0xb3   : > { %v481_v28 = vrot.slane %v333_v39, 7 }
  0xb5   : > { %v1821_v40 = vpop.permute.xlu1 %372 }
  0xb6   : > { %v343_v41 = vpop.permute.xlu0 %342 }
  0xb7   : > { %v503_v44 = vsel %vm443_vm0, %v502_v43, %v343_v41 }
  0xb8   : > { %v504_v50 = vsel %vm445_vm1, %v502_v43, %v503_v44  ;;  %v482_v44 = vsel %vm443_vm0, %v481_v28, %v1772_v2  ;;  %v469_v2 = vsel %vm445_vm1, %v467_v37, %v468_v51 }
  0xb9   : > { %v1824_v45 = vpop.permute.xlu1 %346  ;;  %v505_v56 = vsel %vm447_vm2, %v502_v43, %v504_v50  ;;  %v483_v49 = vsel %vm445_vm1, %v481_v28, %v482_v44 }
  0xba   : > { %v351_v47 = vpop.permute.xlu0 %350  ;;  %v506_v0 = vsel %vm449_vm3, %v502_v43, %v505_v56  ;;  %v454_v43 = vsel %vm443_vm0, %v453_v27, %v1668_v42 }
  0xbb   : > { %v517_v53 = vsel %vm443_vm0, %v516_v48, %v351_v47 }
  0xbc   : > { %v518_v58 = vsel %vm445_vm1, %v516_v48, %v517_v53 }
  0xbd   : > { %v1828_v54 = vpop.permute.xlu1 %354  ;;  %v519_v3 = vsel %vm447_vm2, %v516_v48, %v518_v58 }
  0xbe   : > { %v359_v55 = vpop.permute.xlu0 %358  ;;  %v520_v12 = vsel %vm449_vm3, %v516_v48, %v519_v3 }
  0xbf   : > { %v531_v57 = vsel %vm443_vm0, %v530_v52, %v359_v55 }
  0xc0   : > { %v532_v59 = vsel %vm445_vm1, %v530_v52, %v531_v57 }
  0xc1   : > { %v533_v61 = vsel %vm447_vm2, %v530_v52, %v532_v59  ;;  %v1835_v62 = vpop.permute.xlu1 %362  ;;  %v484_v59 = vsel %vm447_vm2, %v481_v28, %v483_v49 }
  0xc2   : > { %v367_v63 = vpop.permute.xlu0 %366  ;;  %v534_v1 = vsel %vm449_vm3, %v530_v52, %v533_v61  ;;  %v455_v52 = vsel %vm445_vm1, %v453_v27, %v454_v43 }
  0xc3   : > { %v545_v4 = vsel %vm443_vm0, %v544_v60, %v367_v63  ;;  %v709_v5 = vcombine.low %v506_v0, %v534_v1  ;;  %v456_v58 = vsel %vm447_vm2, %v453_v27, %v455_v52  ;;  %v470_v0 = vsel %vm447_vm2, %v467_v37, %v469_v2 }
  0xc4   : > { %v546_v6 = vsel %vm445_vm1, %v544_v60, %v545_v4  ;;  %v537_v1 = vrot.slane %v1819_v38, 7 }
  0xc5   : > { %v547_v8 = vsel %vm447_vm2, %v544_v60, %v546_v6  ;;  %v1843_v9 = vpop.permute.xlu1 %370  ;;  %v1846_v10 = vrot.slane %v709_v5, %v1785_v19  ;;  %v457_v6 = vsel %vm449_vm3, %v453_v27, %v456_v58  ;;  %v471_v27 = vsel %vm449_vm3, %v467_v37, %v470_v0 }
  0xc6   : > { %v377_v11 = vpop.permute.xlu0 %376  ;;  %v548_v13 = vsel %vm449_vm3, %v544_v60, %v547_v8  ;;  %v509_v8 = vrot.slane %v1792_v29, 7  ;;  %v551_v29 = vrot.slane %v1821_v40, 7  ;;  %v523_v40 = vrot.slane %v1809_v35, 7 }
  0xc7   : > { %878 = vrot.lane.b32.xlu0 %v1846_v10, %s1578_s11  ;;  %v1854_v14 = vcombine.high %v1846_v10, %v1579_v7  ;;  %v781_v15 = vcombine.low %v520_v12, %v548_v13  ;;  %v558_v41 = vrot.slane %v377_v11, 7  ;;  %v808_v2 = vcombine.low %v471_v27, %v1807_v34 }
  0xc9   : > { %v1856_v16 = vpop.permute.xlu1 %380  ;;  %886 = vrot.lane.b32.xlu1 %v1854_v14, %s1578_s11  ;;  %v1861_v17 = vrot.slane %v781_v15, %v1785_v19  ;;  %v485_v15 = vsel %vm449_vm3, %v481_v28, %v484_v59 }
  0xca   : > { %v385_v18 = vpop.permute.xlu0 %384  ;;  %v736_v37 = vcombine.low %v457_v6, %v485_v15  ;;  %v565_v58 = vrot.slane %v1856_v16, 7 }
  0xcb   : > { %910 = vrot.lane.b32.xlu0 %v1861_v17, %s1578_s11  ;;  %v1867_v20 = vcombine.high %v1861_v17, %v1579_v7  ;;  %v572_v39 = vrot.slane %v385_v18, 7  ;;  %v538_v18 = vsel %vm443_vm0, %v537_v1, %v1835_v62 }
  0xcc   : > { %v539_v62 = vsel %vm445_vm1, %v537_v1, %v538_v18 }
  0xcd   : > { %v1869_v22 = vpop.permute.xlu1 %388  ;;  %918 = vrot.lane.b32.xlu1 %v1867_v20, %s1578_s11  ;;  %v540_v35 = vsel %vm447_vm2, %v537_v1, %v539_v62 }
  0xce   : > { %v393_v23 = vpop.permute.xlu0 %392 }
  0xcf   : > { %v586_v55 = vrot.slane %v393_v23, 7 }
  0xd1   : > { %v1873_v24 = vpop.permute.xlu1 %396 }
  0xd2   : > { %v401_v25 = vpop.permute.xlu0 %400 }
  0xd3   : > { %v600_v3 = vrot.slane %v401_v25, 7 }
  0xd5   : > { %v1876_v32 = vpop.permute.xlu1 %404 }
  0xd6   : > { %v375_v33 = vpop.permute.xlu0 %374 }
  0xd7   : > { %v559_v47 = vsel %vm443_vm0, %v558_v41, %v375_v33 }
  0xd8   : > { %v560_v53 = vsel %vm445_vm1, %v558_v41, %v559_v47 }
  0xd9   : > { %v1884_v48 = vpop.permute.xlu1 %378  ;;  %v561_v46 = vsel %vm447_vm2, %v558_v41, %v560_v53 }
  0xda   : > { %v383_v50 = vpop.permute.xlu0 %382  ;;  %v562_v12 = vsel %vm449_vm3, %v558_v41, %v561_v46  ;;  %v510_v41 = vsel %vm443_vm0, %v509_v8, %v1824_v45  ;;  %v552_v45 = vsel %vm443_vm0, %v551_v29, %v1843_v9  ;;  %v566_v16 = vsel %vm443_vm0, %v565_v58, %v1884_v48 }
  0xdb   : > { %v573_v42 = vsel %vm443_vm0, %v572_v39, %v383_v50  ;;  %v511_v53 = vsel %vm445_vm1, %v509_v8, %v510_v41  ;;  %v1976_v48 = vrot.slane %v808_v2, %v1785_v19 }
  0xdc   : > { %v574_v61 = vsel %vm445_vm1, %v572_v39, %v573_v42  ;;  %v512_v46 = vsel %vm447_vm2, %v509_v8, %v511_v53 }
  0xdd   : > { %v1892_v56 = vpop.permute.xlu1 %386  ;;  %v575_v38 = vsel %vm447_vm2, %v572_v39, %v574_v61 }
  0xde   : > { %v391_v57 = vpop.permute.xlu0 %390  ;;  %v576_v50 = vsel %vm449_vm3, %v572_v39, %v575_v38  ;;  %v593_v39 = vrot.slane %v1873_v24, 7 }
  0xdf   : > { %v587_v60 = vsel %vm443_vm0, %v586_v55, %v391_v57  ;;  %v553_v57 = vsel %vm445_vm1, %v551_v29, %v552_v45 }
  0xe0   : > { %v588_v63 = vsel %vm445_vm1, %v586_v55, %v587_v60  ;;  %v607_v60 = vrot.slane %v1876_v32, 7  ;;  %v554_v0 = vsel %vm447_vm2, %v551_v29, %v553_v57 }
  0xe1   : > { %v589_v4 = vsel %vm447_vm2, %v586_v55, %v588_v63  ;;  %v395_v5 = vpop.permute.xlu1 %394  ;;  %v541_v63 = vsel %vm449_vm3, %v537_v1, %v540_v35  ;;  %v513_v1 = vsel %vm449_vm3, %v509_v8, %v512_v46 }
  0xe2   : > { %v399_v11 = vpop.permute.xlu0 %398  ;;  %v590_v13 = vsel %vm449_vm3, %v586_v55, %v589_v4  ;;  %v524_v55 = vsel %vm443_vm0, %v523_v40, %v1828_v54  ;;  %v594_v24 = vsel %vm443_vm0, %v593_v39, %v395_v5  ;;  %v1951_v54 = vrot.slane %v736_v37, %v1785_v19 }
  0xe3   : > { %v601_v23 = vsel %vm443_vm0, %v600_v3, %v399_v11  ;;  %v718_v25 = vcombine.low %v562_v12, %v590_v13  ;;  %v525_v61 = vsel %vm445_vm1, %v523_v40, %v524_v55  ;;  %v595_v32 = vsel %vm445_vm1, %v593_v39, %v594_v24 }
  0xe4   : > { %v602_v33 = vsel %vm445_vm1, %v600_v3, %v601_v23  ;;  %v1973_v11 = vcombine.high %v1951_v54, %v1579_v7  ;;  %v567_v12 = vsel %vm445_vm1, %v565_v58, %v566_v16  ;;  %v745_v15 = vcombine.low %v513_v1, %v541_v63 }
  0xe5   : > { %v603_v43 = vsel %vm447_vm2, %v600_v3, %v602_v33  ;;  %v403_v28 = vpop.permute.xlu1 %402  ;;  %v1920_v44 = vrot.slane %v718_v25, %v1785_v19  ;;  %v596_v18 = vsel %vm447_vm2, %v593_v39, %v595_v32  ;;  %v555_v23 = vsel %vm449_vm3, %v551_v29, %v554_v0 }
  0xe6   : > { %v1923_v47 = vpop.permute.xlu0 %408  ;;  %v604_v51 = vsel %vm449_vm3, %v600_v3, %v603_v43  ;;  %v579_v3 = vrot.slane %v1869_v22, 7  ;;  %v608_v4 = vsel %vm443_vm0, %v607_v60, %v403_v28  ;;  %v526_v22 = vsel %vm447_vm2, %v523_v40, %v525_v61 }
  0xe7   : > { %880 = vrot.lane.b32.xlu0 %v1920_v44, %s1578_s11  ;;  %v1934_v52 = vcombine.high %v1920_v44, %v1579_v7  ;;  %v790_v49 = vcombine.low %v576_v50, %v604_v51  ;;  %v609_v38 = vsel %vm445_vm1, %v607_v60, %v608_v4  ;;  %v568_v8 = vsel %vm447_vm2, %v565_v58, %v567_v12 }
  0xe8   : > { %v580_v13 = vsel %vm443_vm0, %v579_v3, %v1892_v56  ;;  %v1994_v56 = vcombine.high %v1976_v48, %v1579_v7  ;;  %v527_v41 = vsel %vm449_vm3, %v523_v40, %v526_v22  ;;  %v610_v43 = vsel %vm447_vm2, %v607_v60, %v609_v38 }
  0xe9   : > { %v413_v42 = vpop.permute.xlu1 %412  ;;  %888 = vrot.lane.b32.xlu1 %v1934_v52, %s1578_s11  ;;  %v1944_v9 = vrot.slane %v790_v49, %v1785_v19  ;;  %v581_v33 = vsel %vm445_vm1, %v579_v3, %v580_v13  ;;  %v2001_v29 = vrot.slane %v745_v15, %v1785_v19  ;;  %v817_v28 = vcombine.low %v527_v41, %v555_v23 }
  0xea   : > { %v417_v59 = vpop.permute.xlu0 %416  ;;  %v597_v62 = vsel %vm449_vm3, %v593_v39, %v596_v18  ;;  %v582_v50 = vsel %vm447_vm2, %v579_v3, %v581_v33  ;;  %v569_v37 = vsel %vm449_vm3, %v565_v58, %v568_v8  ;;  %v611_v49 = vsel %vm449_vm3, %v607_v60, %v610_v43 }
  0xeb   : > { %912 = vrot.lane.b32.xlu0 %v1944_v9, %s1578_s11  ;;  %v1959_v34 = vcombine.high %v1944_v9, %v1579_v7  ;;  %v754_v45 = vcombine.low %v569_v37, %v597_v62  ;;  %v614_v53 = vrot.slane %v1923_v47, 7  ;;  %v2014_v39 = vcombine.high %v2001_v29, %v1579_v7 }
  0xec   : > { %v2017_v55 = vrot.slane %v817_v28, %v1785_v19  ;;  %v583_v35 = vsel %vm449_vm3, %v579_v3, %v582_v50  ;;  %v621_v47 = vrot.slane %v413_v42, 7  ;;  %v628_v60 = vrot.slane %v417_v59, 7 }
  0xed   : > { %v421_v5 = vpop.permute.xlu1 %420  ;;  %920 = vrot.lane.b32.xlu1 %v1959_v34, %s1578_s11  ;;  %v826_v58 = vcombine.low %v583_v35, %v611_v49  ;;  %v2024_v46 = vrot.slane %v754_v45, %v1785_v19 }
  0xee   : > { %v425_v6 = vpop.permute.xlu0 %424  ;;  %v2030_v61 = vcombine.high %v2017_v55, %v1579_v7  ;;  %v635_v1 = vrot.slane %v421_v5, 7 }
  0xef   : > { %892 = vrot.lane.b32.xlu0 %v1951_v54, %s1578_s11  ;;  %v642_v0 = vrot.slane %v425_v6, 7  ;;  %v2038_v59 = vrot.slane %v826_v58, %v1785_v19  ;;  %v2042_v4 = vcombine.high %v2024_v46, %v1579_v7 }
  0xf1   : > { %v429_v25 = vpop.permute.xlu1 %428  ;;  %900 = vrot.lane.b32.xlu1 %v1973_v11, %s1578_s11  ;;  %v2057_v33 = vcombine.high %v2038_v59, %v1579_v7 }
  0xf2   : > { %v433_v27 = vpop.permute.xlu0 %432  ;;  %v649_v13 = vrot.slane %v429_v25, 7 }
  0xf3   : > { %924 = vrot.lane.b32.xlu0 %v1976_v48, %s1578_s11  ;;  %v656_v38 = vrot.slane %v433_v27, 7 }
  0xf5   : > { %v437_v51 = vpop.permute.xlu1 %436  ;;  %932 = vrot.lane.b32.xlu1 %v1994_v56, %s1578_s11 }
  0xf6   : > { %v407_v40 = vpop.permute.xlu0 %406  ;;  %v663_v45 = vrot.slane %v437_v51, 7 }
  0xf7   : > { %894 = vrot.lane.b32.xlu0 %v2001_v29, %s1578_s11  ;;  %v615_v2 = vsel %vm443_vm0, %v614_v53, %v407_v40 }
  0xf8   : > { %v616_v16 = vsel %vm445_vm1, %v614_v53, %v615_v2 }
  0xf9   : > { %v411_v57 = vpop.permute.xlu1 %410  ;;  %902 = vrot.lane.b32.xlu1 %v2014_v39, %s1578_s11  ;;  %v617_v22 = vsel %vm447_vm2, %v614_v53, %v616_v16 }
  0xfa   : > { %v415_v24 = vpop.permute.xlu0 %414  ;;  %v622_v63 = vsel %vm443_vm0, %v621_v47, %v411_v57  ;;  %v618_v28 = vsel %vm449_vm3, %v614_v53, %v617_v22 }
  0xfb   : > { %926 = vrot.lane.b32.xlu0 %v2017_v55, %s1578_s11  ;;  %v629_v3 = vsel %vm443_vm0, %v628_v60, %v415_v24  ;;  %v623_v12 = vsel %vm445_vm1, %v621_v47, %v622_v63 }
  0xfc   : > { %v630_v15 = vsel %vm445_vm1, %v628_v60, %v629_v3  ;;  %v624_v41 = vsel %vm447_vm2, %v621_v47, %v623_v12 }
  0xfd   : > { %v419_v42 = vpop.permute.xlu1 %418  ;;  %934 = vrot.lane.b32.xlu1 %v2030_v61, %s1578_s11  ;;  %v631_v62 = vsel %vm447_vm2, %v628_v60, %v630_v15  ;;  %v625_v24 = vsel %vm449_vm3, %v621_v47, %v624_v41 }
  0xfe   : > { %v423_v32 = vpop.permute.xlu0 %422  ;;  %v636_v23 = vsel %vm443_vm0, %v635_v1, %v419_v42 }
  0xff   : > { %v643_v6 = vsel %vm443_vm0, %v642_v0, %v423_v32  ;;  %896 = vrot.lane.b32.xlu0 %v2024_v46, %s1578_s11  ;;  %v637_v49 = vsel %vm445_vm1, %v635_v1, %v636_v23 }
 0x100   : > { %v644_v18 = vsel %vm445_vm1, %v642_v0, %v643_v6  ;;  %v638_v42 = vsel %vm447_vm2, %v635_v1, %v637_v49 }
 0x101   : > { %v645_v8 = vsel %vm447_vm2, %v642_v0, %v644_v18  ;;  %v427_v5 = vpop.permute.xlu1 %426  ;;  %904 = vrot.lane.b32.xlu1 %v2042_v4, %s1578_s11 }
 0x102   : > { %v650_v25 = vsel %vm443_vm0, %v649_v13, %v427_v5  ;;  %v431_v43 = vpop.permute.xlu0 %430  ;;  %v646_v27 = vsel %vm449_vm3, %v642_v0, %v645_v8  ;;  %v632_v0 = vsel %vm449_vm3, %v628_v60, %v631_v62 }
 0x103   : > { %v651_v50 = vsel %vm445_vm1, %v649_v13, %v650_v25  ;;  %v657_v37 = vsel %vm443_vm0, %v656_v38, %v431_v43  ;;  %928 = vrot.lane.b32.xlu0 %v2038_v59, %s1578_s11  ;;  %v727_v40 = vcombine.low %v618_v28, %v646_v27 }
 0x104   : > { %v652_v35 = vsel %vm447_vm2, %v649_v13, %v651_v50  ;;  %v658_v2 = vsel %vm445_vm1, %v656_v38, %v657_v37 }
 0x105   : > { %v659_v53 = vsel %vm447_vm2, %v656_v38, %v658_v2  ;;  %v435_v57 = vpop.permute.xlu1 %434  ;;  %936 = vrot.lane.b32.xlu1 %v2057_v33, %s1578_s11  ;;  %v2075_v58 = vrot.slane %v727_v40, %v1785_v19  ;;  %v653_v16 = vsel %vm449_vm3, %v649_v13, %v652_v35  ;;  %v639_v13 = vsel %vm449_vm3, %v635_v1, %v638_v42 }
 0x106   : > { %v664_v51 = vsel %vm443_vm0, %v663_v45, %v435_v57  ;;  %v763_v63 = vcombine.low %v625_v24, %v653_v16  ;;  %v660_v3 = vsel %vm449_vm3, %v656_v38, %v659_v53 }
 0x107   : > { %v665_v32 = vsel %vm445_vm1, %v663_v45, %v664_v51  ;;  %882 = vrot.lane.b32.xlu0 %v2075_v58, %s1578_s11  ;;  %v2088_v22 = vcombine.high %v2075_v58, %v1579_v7  ;;  %v799_v47 = vcombine.low %v632_v0, %v660_v3 }
 0x108   : > { %v666_v12 = vsel %vm447_vm2, %v663_v45, %v665_v32  ;;  %v2092_v6 = vrot.slane %v763_v63, %v1785_v19 }
 0x109   : > { %890 = vrot.lane.b32.xlu1 %v2088_v22, %s1578_s11  ;;  %v667_v60 = vsel %vm449_vm3, %v663_v45, %v666_v12  ;;  %v2105_v18 = vrot.slane %v799_v47, %v1785_v19 }
 0x10a   : > { %v2102_v15 = vcombine.high %v2092_v6, %v1579_v7  ;;  %v835_v38 = vcombine.low %v639_v13, %v667_v60 }
 0x10b   : > { %898 = vrot.lane.b32.xlu0 %v2092_v6, %s1578_s11  ;;  %v2113_v1 = vcombine.high %v2105_v18, %v1579_v7 }
 0x10c   : > { %v2116_v23 = vrot.slane %v835_v38, %v1785_v19 }
 0x10d   : > { %906 = vrot.lane.b32.xlu1 %v2102_v15, %s1578_s11 }
 0x10e   : > { %v2124_v8 = vcombine.high %v2116_v23, %v1579_v7 }
 0x10f   : > { %914 = vrot.lane.b32.xlu0 %v2105_v18, %s1578_s11 }
 0x111   : > { %922 = vrot.lane.b32.xlu1 %v2113_v1, %s1578_s11 }
 0x113   : > { %930 = vrot.lane.b32.xlu0 %v2116_v23, %s1578_s11 }
 0x115   : > { %938 = vrot.lane.b32.xlu1 %v2124_v8, %s1578_s11 }
 0x11b   : > { %v877_v5 = vpop.permute.xlu0 %876 }
 0x11c   : > { %v972_v2 = vmax.f32 %v1788_v26, %v877_v5 }
 0x11d   : > { %v885_v41 = vpop.permute.xlu1 %884 }
 0x11e   : > { %v976_v7 = vmax.f32 %v1798_v30, %v885_v41 }
 0x11f   : > { %v909_v25 = vpop.permute.xlu0 %908 }
 0x120   : > { %v1004_v24 = vcombine.low %v972_v2, %v976_v7  ;;  %v988_v63 = vmax.f32 %v1801_v31, %v909_v25 }
 0x121   : > { %v917_v43 = vpop.permute.xlu1 %916 }
 0x122   : > { %v992_v53 = vmax.f32 %v1815_v36, %v917_v43  ;;  %v1011_v47 = vrot.slane %v1004_v24, %v1785_v19 }
 0x124   : > { %v1022_v42 = vcombine.low %v988_v63, %v992_v53 }
 0x139   : > { %v879_v28 = vpop.permute.xlu0 %878 }
 0x13a   : > { %v973_v5 = vmax.f32 %v1846_v10, %v879_v28 }
 0x13b   : > { %v887_v27 = vpop.permute.xlu1 %886 }
 0x13c   : > { %v977_v60 = vmax.f32 %v1854_v14, %v887_v27 }
 0x13d   : > { %v911_v62 = vpop.permute.xlu0 %910 }
 0x13e   : > { %v1040_v14 = vcombine.low %v973_v5, %v977_v60 }
 0x13f   : > { %v919_v50 = vpop.permute.xlu1 %918 }
 0x140   : > { %v993_v31 = vmax.f32 %v1867_v20, %v919_v50 }
 0x159   : > { %v881_v37 = vpop.permute.xlu0 %880 }
 0x15b   : > { %v889_v40 = vpop.permute.xlu1 %888 }
 0x15d   : > { %v2128_v45 = vpop.permute.xlu0 %912 }
 0x15f   : > { %v2130_v49 = vpop.permute.xlu1 %920 }
 0x161   : > { %v893_v35 = vpop.permute.xlu0 %892 }
 0x162   : > { %v980_v16 = vmax.f32 %v1951_v54, %v893_v35 }
 0x163   : > { %v901_v57 = vpop.permute.xlu1 %900 }
 0x164   : > { %v984_v51 = vmax.f32 %v1973_v11, %v901_v57  ;;  %v1029_v11 = vrot.slane %v1022_v42, %v1785_v19 }
 0x165   : > { %v925_v0 = vpop.permute.xlu0 %924 }
 0x166   : > { %v1013_v3 = vcombine.low %v980_v16, %v984_v51  ;;  %v996_v26 = vmax.f32 %v1976_v48, %v925_v0  ;;  %v1047_v16 = vrot.slane %v1040_v14, %v1785_v19  ;;  %v994_v51 = vmax.f32 %v1959_v34, %v2130_v49 }
 0x167   : > { %v933_v32 = vpop.permute.xlu1 %932 }
 0x168   : > { %v1020_v30 = vrot.slane %v1013_v3, %v1785_v19  ;;  %v1000_v36 = vmax.f32 %v1994_v56, %v933_v32  ;;  %v989_v56 = vmax.f32 %v1861_v17, %v911_v62 }
 0x169   : > { %v895_v12 = vpop.permute.xlu0 %894 }
 0x16a   : > { %v1152_v54 = vcombine.low %v1011_v47, %v1020_v30  ;;  %v1031_v13 = vcombine.low %v996_v26, %v1000_v36  ;;  %v981_v25 = vmax.f32 %v2001_v29, %v895_v12  ;;  %v1464_v43 = vcombine.high %v1011_v47, %v1020_v30 }
 0x16b   : > { %v903_v38 = vpop.permute.xlu1 %902  ;;  %v1058_v53 = vcombine.low %v989_v56, %v993_v31 }
 0x16c   : > { %v1038_v41 = vrot.slane %v1031_v13, %v1785_v19  ;;  %v985_v48 = vmax.f32 %v2014_v39, %v903_v38  ;;  %v978_v39 = vmax.f32 %v1934_v52, %v889_v40  ;;  %v1182_v50 = vrot.slane %v1464_v43, %v1652_v21 }
 0x16d   : > { %v927_v7 = vpop.permute.xlu0 %926  ;;  %v2160_v24 = vrot.slane %v1152_v54, %v1652_v21  ;;  %v1065_v40 = vrot.slane %v1058_v53, %v1785_v19 }
 0x16e   : > { %v1153_v27 = vcombine.low %v1029_v11, %v1038_v41  ;;  %v1465_v35 = vcombine.high %v1029_v11, %v1038_v41  ;;  %v1049_v2 = vcombine.low %v981_v25, %v985_v48  ;;  %v997_v20 = vmax.f32 %v2017_v55, %v927_v7 }
 0x16f   : > { %v935_v57 = vpop.permute.xlu1 %934 }
 0x170   : > { %v1001_v10 = vmax.f32 %v2030_v61, %v935_v57  ;;  %v1189_v28 = vrot.slane %v1465_v35, %v1652_v21  ;;  %v2154_v29 = vrot.slane %v1153_v27, %v1652_v21  ;;  %v1056_v17 = vrot.slane %v1049_v2, %v1785_v19 }
 0x171   : > { %v897_v62 = vpop.permute.xlu0 %896  ;;  %v974_v61 = vmax.f32 %v1920_v44, %v881_v37  ;;  %v990_v44 = vmax.f32 %v1944_v9, %v2128_v45 }
 0x172   : > { %v1067_v55 = vcombine.low %v997_v20, %v1001_v10  ;;  %v1190_v0 = vcombine.low %v1182_v50, %v1189_v28  ;;  %v1168_v52 = vcombine.low %v2160_v24, %v2154_v29  ;;  %v982_v42 = vmax.f32 %v2024_v46, %v897_v62 }
 0x173   : > { %v905_v63 = vpop.permute.xlu1 %904  ;;  %v1076_v47 = vcombine.low %v974_v61, %v978_v39  ;;  %v1198_v37 = vcombine.low %v1047_v16, %v1056_v17  ;;  %v1466_v30 = vcombine.high %v1047_v16, %v1056_v17  ;;  %v1094_v12 = vcombine.low %v990_v44, %v994_v51 }
 0x174   : > { %v1074_v3 = vrot.slane %v1067_v55, %v1785_v19  ;;  %v986_v32 = vmax.f32 %v2042_v4, %v905_v63  ;;  %1191 = vrot.lane.b32.xlu0 %v1190_v0, %s1580_s19 }
 0x175   : > { %v929_v34 = vpop.permute.xlu0 %928  ;;  %v1083_v45 = vrot.slane %v1076_v47, %v1785_v19  ;;  %v1230_v31 = vrot.slane %v1466_v30, %v1652_v21  ;;  %v1206_v38 = vrot.slane %v1198_v37, %v1652_v21  ;;  %v1101_v56 = vrot.slane %v1094_v12, %v1785_v19 }
 0x176   : > { %v1199_v49 = vcombine.low %v1065_v40, %v1074_v3  ;;  %v1467_v26 = vcombine.high %v1065_v40, %v1074_v3  ;;  %v1085_v36 = vcombine.low %v982_v42, %v986_v32  ;;  %v998_v60 = vmax.f32 %v2038_v59, %v929_v34 }
 0x177   : > { %v937_v54 = vpop.permute.xlu1 %936 }
 0x178   : > { %v1092_v46 = vrot.slane %v1085_v36, %v1785_v19  ;;  %v1002_v4 = vmax.f32 %v2057_v33, %v937_v54  ;;  %v1237_v13 = vrot.slane %v1467_v26, %v1652_v21  ;;  %v1213_v9 = vrot.slane %v1199_v49, %v1652_v21 }
 0x179   : > { %v883_v11 = vpop.permute.xlu0 %882 }
 0x17a   : > { %v1103_v5 = vcombine.low %v998_v60, %v1002_v4  ;;  %v1468_v41 = vcombine.high %v1083_v45, %v1092_v46  ;;  %v1238_v59 = vcombine.low %v1230_v31, %v1237_v13  ;;  %v1214_v48 = vcombine.low %v1206_v38, %v1213_v9 }
 0x17b   : > { %v891_v25 = vpop.permute.xlu1 %890  ;;  %v1246_v43 = vcombine.low %v1083_v45, %v1092_v46  ;;  %v975_v55 = vmax.f32 %v2075_v58, %v883_v11 }
 0x17c   : > { %v1110_v33 = vrot.slane %v1103_v5, %v1785_v19  ;;  %1239 = vrot.lane.b32.xlu0 %v1238_v59, %s1581_s20  ;;  %1215 = vrot.lane.b32.xlu1 %v1214_v48, %s1576_s10  ;;  %v1278_v2 = vrot.slane %v1468_v41, %v1652_v21  ;;  %v979_v39 = vmax.f32 %v2088_v22, %v891_v25 }
 0x17d   : > { %v899_v7 = vpop.permute.xlu0 %898  ;;  %v1254_v20 = vrot.slane %v1246_v43, %v1652_v21 }
 0x17e   : > { %v1247_v14 = vcombine.low %v1101_v56, %v1110_v33  ;;  %v1469_v27 = vcombine.high %v1101_v56, %v1110_v33  ;;  %v983_v17 = vmax.f32 %v2092_v6, %v899_v7  ;;  %v1112_v63 = vcombine.low %v975_v55, %v979_v39 }
 0x17f   : > { %v907_v35 = vpop.permute.xlu1 %906 }
 0x180   : > { %v987_v53 = vmax.f32 %v2102_v15, %v907_v35  ;;  %v1285_v57 = vrot.slane %v1469_v27, %v1652_v21  ;;  %v1261_v10 = vrot.slane %v1247_v14, %v1652_v21  ;;  %v1119_v58 = vrot.slane %v1112_v63, %v1785_v19 }
 0x181   : > { %v915_v28 = vpop.permute.xlu0 %914 }
 0x182   : > { %v1286_v62 = vcombine.low %v1278_v2, %v1285_v57  ;;  %v1262_v50 = vcombine.low %v1254_v20, %v1261_v10  ;;  %v1121_v61 = vcombine.low %v983_v17, %v987_v53  ;;  %v991_v0 = vmax.f32 %v2105_v18, %v915_v28 }
 0x183   : > { %v923_v16 = vpop.permute.xlu1 %922 }
 0x184   : > { %v995_v51 = vmax.f32 %v2113_v1, %v923_v16  ;;  %1287 = vrot.lane.b32.xlu0 %v1286_v62, %s1582_s21  ;;  %1263 = vrot.lane.b32.xlu1 %v1262_v50, %s1575_s9  ;;  %v1128_v22 = vrot.slane %v1121_v61, %v1785_v19 }
 0x185   : > { %v931_v15 = vpop.permute.xlu0 %930 }
 0x186   : > { %v1130_v6 = vcombine.low %v991_v0, %v995_v51  ;;  %v999_v3 = vmax.f32 %v2116_v23, %v931_v15  ;;  %v1294_v1 = vcombine.low %v1119_v58, %v1128_v22  ;;  %v1470_v47 = vcombine.high %v1119_v58, %v1128_v22 }
 0x187   : > { %v939_v40 = vpop.permute.xlu1 %938 }
 0x188   : > { %v1003_v42 = vmax.f32 %v2124_v8, %v939_v40  ;;  %v1137_v44 = vrot.slane %v1130_v6, %v1785_v19  ;;  %v1326_v34 = vrot.slane %v1470_v47, %v1652_v21  ;;  %v1302_v8 = vrot.slane %v1294_v1, %v1652_v21 }
 0x18a   : > { %v1139_v32 = vcombine.low %v999_v3, %v1003_v42 }
 0x18c   : > { %v1146_v37 = vrot.slane %v1139_v32, %v1785_v19 }
 0x18e   : > { %v1295_v30 = vcombine.low %v1137_v44, %v1146_v37  ;;  %v1471_v18 = vcombine.high %v1137_v44, %v1146_v37 }
 0x190   : > { %v1333_v23 = vrot.slane %v1471_v18, %v1652_v21  ;;  %v1309_v49 = vrot.slane %v1295_v30, %v1652_v21 }
 0x192   : > { %v1334_v26 = vcombine.low %v1326_v34, %v1333_v23  ;;  %v1310_v36 = vcombine.low %v1302_v8, %v1309_v49 }
 0x194   : > { %1335 = vrot.lane.b32.xlu0 %v1334_v26, %s1583_s22  ;;  %1311 = vrot.lane.b32.xlu1 %v1310_v36, %s1574_s8 }
 0x1e6   : > { %v1192_v19 = vpop.permute.xlu0 %1191 }
 0x1e7   : > { %v1339_v60 = vsel %vm1338_vm4, %v1168_v52, %v1192_v19 }
 0x1ee   : > { %v1216_v12 = vpop.permute.xlu1 %1215  ;;  %v1240_v54 = vpop.permute.xlu0 %1239 }
 0x1ef   : > { %v1341_v46 = vsel %vm1340_vm5, %v1339_v60, %v1216_v12 }
 0x1f0   : > { %v1343_v13 = vsel %vm1342_vm6, %v1341_v46, %v1240_v54 }
 0x1f6   : > { %v1264_v21 = vpop.permute.xlu1 %1263  ;;  %v1288_v4 = vpop.permute.xlu0 %1287 }
 0x1f7   : > { %v1345_v9 = vsel %vm1344_vm7, %v1343_v13, %v1264_v21 }
 0x1f8   : > { %v1347_v29 = vsel %vm1346_vm8, %v1345_v9, %v1288_v4 }
 0x206   : > { %v1336_v45 = vpop.permute.xlu0 %1335  ;;  %v1312_v24 = vpop.permute.xlu1 %1311 }
 0x207   : > { %v1349_v52 = vsel %vm1348_vm9, %v1347_v29, %v1312_v24 }
 0x208   : > { %v1351_v11 = vsel %vm1350_vm10, %v1349_v52, %v1336_v45 }
 0x209   : > { %1353 = vst.msk [vmem:[%s209_s27] sm:$0xff] %vm1352_vm11, %v1351_v11 }
 0x20a PF: > { %s13_s16 = sadd.s32 1, %s1567_s16   ;;  %s2235_s12 = smov %s1559_s14 }
 0x20b   : > { %p10_p8 = scmp.ge.s32.totalorder %s13_s16, 18   ;;  %s2236_s13 = smov %s1563_s15 }
 0x20c   : > { %s2237_s14 = smov %s2240_s17  ;;  %s2238_s15 = smov %s2244_s18 }
 0x20d   :  { %12 = sbr.rel (!%p10_p8) target bundleno = 3 (0x3), region = 62 }

</bundles_post_ra>
